<compile_context>
chip_gen: v7x
topology: tpu7x:2x2x1
jax: 0.10.0
libtpu: 0.0.40
codegen_flags: <defaults>
</compile_context>

<pallas_src>
import math
from functools import partial

import jax
import jax.numpy as jnp
from jax.experimental import pallas as pl
from jax.experimental.pallas import tpu as pltpu


def _round_up(x, m):
    return (x + m - 1) // m * m


def _vmem_capacity_bytes():
    try:
        return int(pltpu.get_tpu_info().vmem_capacity_bytes)
    except Exception:
        return 64 * 1024 * 1024          # conservative fallback: v7x per-TC VMEM


def _spec(block_shape, index_map, buffers=None):
    """BlockSpec with optional N-deep pipelining (falls back if unsupported)."""
    if buffers is not None and hasattr(pl, "Buffered"):
        try:
            return pl.BlockSpec(block_shape, index_map,
                                pipeline_mode=pl.Buffered(buffers))
        except TypeError:
            pass
    return pl.BlockSpec(block_shape, index_map)


# -----------------------------------------------------------------------------
# Kernel 1: EEPLAttention + concat([mask_emb, attention_emb])  (batched, bf16 K)
# -----------------------------------------------------------------------------
def _attn_concat_kernel(q_ref, k_ref, me_ref, a_ref, *, scale):
    q = q_ref[...]                                               # (ab, H)    bf16
    K = k_ref[...]                                               # (ab, S, H) bf16
    # batched dot_general on the MXU (no (ab,S,H) f32 temporaries)
    s = jnp.einsum("bqh,bsh->bqs", q[:, None, :], K,
                   preferred_element_type=jnp.float32)[:, 0, :] * scale  # (ab, S)
    m = jnp.max(s, axis=-1, keepdims=True)
    p = jnp.exp(s - m)
    p = p * pl.reciprocal(jnp.sum(p, axis=-1, keepdims=True), approx=True)
    attn = jnp.einsum("bqs,bsh->bqh", p.astype(K.dtype)[:, None, :], K,
                      preferred_element_type=jnp.float32)[:, 0, :]       # (ab, H)
    # write concat([mask_emb, attention_emb]) so the fc kernel does one K=2H matmul
    a_ref[...] = jnp.concatenate([me_ref[...], attn.astype(a_ref.dtype)], axis=-1)


# -----------------------------------------------------------------------------
# Kernel 2: fc + vocab mask + full-vocab online softmax (+ mask re-apply)
# -----------------------------------------------------------------------------
def _fc_softmax_kernel(a_ref, w_ref, b_ref, mask_ref, o_ref,
                       m_sc, l_sc, tm_sc, *, v_tile, num_v_tiles):
    j = pl.program_id(1)

    @pl.when(j == 0)
    def _():
        m_sc[...] = jnp.full_like(m_sc, -jnp.inf)
        l_sc[...] = jnp.zeros_like(l_sc)

    # fc on the (tb, 2H) bf16 concat activations: one MXU matmul per vocab tile
    logit = (jnp.dot(a_ref[...], w_ref[...], preferred_element_type=jnp.float32)
             + b_ref[...])                                        # (tb, tv) f32
    allowed = mask_ref[...] != 0                                  # int8 allow-mask
    x = jnp.where(allowed, logit, -jnp.inf)                       # masked logits

    # --- online softmax over the vocab axis (streaming phase) ----------------
    m_prev = m_sc[...]
    m_new = jnp.maximum(m_prev, jnp.max(x, axis=-1, keepdims=True))
    e = jnp.where(allowed, jnp.exp(x - m_new), 0.0)
    # guard fully-masked prefixes (m_new == -inf): contribution is exactly 0
    alpha = jnp.where(m_new == -jnp.inf, 0.0, jnp.exp(m_prev - m_new))
    l_sc[...] = alpha * l_sc[...] + jnp.sum(e, axis=-1, keepdims=True)
    m_sc[...] = m_new
    tm_sc[j] = m_new                                              # per-tile max

    # store exp(x - m_running); masked positions carry a -1 sentinel (exp >= 0)
    col = pl.multiple_of(j * v_tile, v_tile)
    o_ref[:, pl.ds(col, v_tile)] = jnp.where(allowed, e, -1.0)

    # --- finalize: cheap VPU rescale + mask re-apply (no full-width exp) ------
    @pl.when(j == num_v_tiles - 1)
    def _():
        m_final = m_sc[...]
        inv_l = pl.reciprocal(l_sc[...], approx=True)
        for t in range(num_v_tiles):                              # static unroll
            lo = t * v_tile
            blk = o_ref[:, lo:lo + v_tile]
            scale = jnp.exp(tm_sc[t] - m_final) * inv_l           # (tb, 1)
            o_ref[:, lo:lo + v_tile] = jnp.where(blk < 0.0, -jnp.inf, blk * scale)


# -----------------------------------------------------------------------------
# Wrapper
# -----------------------------------------------------------------------------
def eepl_forward(q_embs, event_labels, text_hidden, mask_emb, text_ids, fc_w, fc_b,
                 *, extra_token_id, compute_dtype=jnp.bfloat16,
                 batch_block=None, vocab_tile=None):
    B, S, H = text_hidden.shape
    V = fc_b.shape[-1]

    # ---------------- generation-aware tiling / VMEM budget -------------------
    vmem_cap = _vmem_capacity_bytes()
    big_vmem = vmem_cap >= 100 * 2**20                 # v5e / v6e (128 MiB VMEM)
    tb_target = batch_block or (256 if big_vmem else 128)
    tv_target = vocab_tile or (4096 if big_vmem else 2048)
    vmem_limit = int(min(vmem_cap - (16 if big_vmem else 10) * 2**20, 100 * 2**20))

    b_pad = _round_up(B, 32)
    tb = 32
    for cand in range(min(_round_up(tb_target, 32), b_pad), 31, -32):
        if b_pad % cand == 0:                          # tb must divide b_pad
            tb = cand
            break
    tv = min(_round_up(tv_target, 128), _round_up(V, 128))
    v_pad = _round_up(V, tv)
    # keep the resident f32 output block within ~half the VMEM budget
    while tb >= 64 and tb * v_pad * 4 > vmem_limit // 2:
        tb //= 2
    # v7x has 2 TensorCores: keep >= 2 blocks along the "parallel" batch axis
    if (not big_vmem) and b_pad // tb < 2 and tb >= 64:
        tb //= 2
    nv = v_pad // tv

    # attention batch block: K double-buffer must fit ~1/4 of VMEM
    ab = 8
    k_blk_bytes = lambda n: 2 * n * S * H * jnp.dtype(compute_dtype).itemsize
    for cand in range(min(tb, b_pad), 7, -8):
        if b_pad % cand == 0 and k_blk_bytes(cand) <= vmem_cap // 4:
            ab = cand
            break

    # ---------------- input preparation --------------------------------------
    q = q_embs[event_labels].astype(compute_dtype)      # (B, H) gather (JAX glue)
    me = mask_emb.astype(compute_dtype)                  # (B, H)
    k = text_hidden.astype(compute_dtype)                # (B, S, H)
    # TODO(synk): pick B a multiple of 32 upstream to avoid this pad copy of K.
    q = jnp.pad(q, ((0, b_pad - B), (0, 0)))
    me = jnp.pad(me, ((0, b_pad - B), (0, 0)))
    k = jnp.pad(k, ((0, b_pad - B), (0, 0), (0, 0)))

    # int8 allow-mask: 1 at text token ids (+ appended extra id, cf. 30583), else 0
    ids = jnp.concatenate([text_ids.astype(jnp.int32),
                           jnp.full((B, 1), int(extra_token_id), jnp.int32)], axis=1)
    ids = jnp.where(ids < V, ids, ids[:, :1])            # never unmask padded cols
    mask = jnp.zeros((b_pad, v_pad), jnp.int8)
    mask = mask.at[jnp.arange(B)[:, None], ids].set(1)
    if b_pad > B:
        mask = mask.at[B:, :].set(1)                     # padded rows stay finite

    w = jnp.pad(fc_w.T.astype(compute_dtype), ((0, 0), (0, v_pad - V)))   # (2H, Vp)
    bias = jnp.pad(fc_b.reshape(1, V).astype(jnp.float32), ((0, 0), (0, v_pad - V)))

    # ---------------- kernel 1: attention + concat ---------------------------
    a_cat = pl.pallas_call(
        partial(_attn_concat_kernel, scale=1.0 / math.sqrt(H)),
        grid=(b_pad // ab,),
        in_specs=[pl.BlockSpec((ab, H), lambda i: (i, 0)),
                  pl.BlockSpec((ab, S, H), lambda i: (i, 0, 0)),
                  pl.BlockSpec((ab, H), lambda i: (i, 0))],
        out_specs=pl.BlockSpec((ab, 2 * H), lambda i: (i, 0)),
        out_shape=jax.ShapeDtypeStruct((b_pad, 2 * H), compute_dtype),
        compiler_params=pltpu.CompilerParams(
            dimension_semantics=("parallel",), vmem_limit_bytes=vmem_limit),
    )(q, k, me)

    # ---------------- kernel 2: fc + masked online softmax -------------------
    nbuf = 3 if nv >= 3 else None       # deepen the critical weight/mask streams
    out = pl.pallas_call(
        partial(_fc_softmax_kernel, v_tile=tv, num_v_tiles=nv),
        grid=(b_pad // tb, nv),
        in_specs=[
            pl.BlockSpec((tb, 2 * H), lambda i, j: (i, 0)),        # activations
            _spec((2 * H, tv), lambda i, j: (0, j), buffers=nbuf), # fc weight tile
            pl.BlockSpec((1, tv), lambda i, j: (0, j)),            # fc bias tile
            _spec((tb, tv), lambda i, j: (i, j), buffers=nbuf),    # int8 allow-mask
        ],
        out_specs=pl.BlockSpec((tb, v_pad), lambda i, j: (i, 0)),  # vocab-resident
        out_shape=jax.ShapeDtypeStruct((b_pad, v_pad), jnp.float32),
        scratch_shapes=[pltpu.VMEM((tb, 1), jnp.float32),          # running max
                        pltpu.VMEM((tb, 1), jnp.float32),          # running sum
                        pltpu.VMEM((nv, tb, 1), jnp.float32)],     # per-tile max
        compiler_params=pltpu.CompilerParams(
            dimension_semantics=("parallel", "arbitrary"),
            vmem_limit_bytes=vmem_limit),
    )(a_cat, w, bias, mask)
    # TODO(synk): for B >> tb, a (vocab-outer, batch-inner) grid with streamed
    # per-tile outputs + a separate rescale pass reads the (2H,Vp) weight once;
    # fp8 weights with per-tile scales would further halve the stream on v7x.
    return out[:B, :V]


if __name__ == "__main__":
    B, S, H, V, E = 2, 8, 32, 500, 4     # batch, seq, hidden, vocab_size, event types
    concatsize = 2 * H

    key = jax.random.PRNGKey(0)
    ks = jax.random.split(key, 6)
    q_embs = jax.random.normal(ks[0], (E, H), jnp.float32)                # nn.Parameter
    event_labels = jax.random.randint(ks[1], (B,), 0, E)
    text_hidden = jax.random.normal(ks[2], (B, S, H), jnp.float32)        # PLM(text)
    mask_emb = jax.random.normal(ks[3], (B, H), jnp.float32)              # PLM(prompt)[mask]
    text_ids = jax.random.randint(ks[4], (B, S), 0, V).astype(jnp.int32)

    limit = math.sqrt(6.0 / (concatsize + V))                             # xavier_uniform
    fc_w = jax.random.uniform(ks[5], (V, concatsize), jnp.float32, -limit, limit)
    fc_b = jnp.zeros((V,), jnp.float32)

    extra_token_id = min(30583, V - 1)   # demo-vocab stand-in for the 30583 constant

    out = eepl_forward(q_embs, event_labels, text_hidden, mask_emb, text_ids,
                       fc_w, fc_b, extra_token_id=extra_token_id,
                       vocab_tile=128)   # small tile -> multi-tile online-softmax path
    jax.block_until_ready(out)
    assert out.shape == (B, V)

    # ------- pure-JAX f32 reference of the module's forward (loose check) -------
    qf = q_embs[event_labels]
    s = jnp.einsum("bh,bsh->bs", qf, text_hidden) / math.sqrt(H)
    p = jax.nn.softmax(s, axis=-1)
    attn = jnp.einsum("bs,bsh->bh", p, text_hidden)
    logit = jnp.concatenate([mask_emb, attn], axis=-1) @ fc_w.T + fc_b
    ids_full = jnp.concatenate([text_ids, jnp.full((B, 1), extra_token_id, jnp.int32)], 1)
    masklabel = jnp.full((B, V), -jnp.inf).at[jnp.arange(B)[:, None], ids_full].set(0.0)
    ref = jax.nn.softmax(logit + masklabel, axis=-1) + masklabel

    allowed = jnp.isfinite(masklabel)
    assert bool(jnp.all(jnp.where(allowed, jnp.isfinite(out), out == -jnp.inf)))
    assert float(jnp.max(jnp.abs(jnp.where(allowed, out - ref, 0.0)))) < 0.05
    print("KERNEL_OK")
</pallas_src>

<mosaic_0001>
module attributes {stable_mosaic.version = 11 : i64} {
  func.func @_attn_concat_kernel(%arg0: i32, %arg1: memref<32x32xbf16, #tpu.memory_space<vmem>>, %arg2: memref<32x8x32xbf16, #tpu.memory_space<vmem>>, %arg3: memref<32x32xbf16, #tpu.memory_space<vmem>>, %arg4: memref<32x64xbf16, #tpu.memory_space<vmem>>) attributes {dimension_semantics = [#tpu.dimension_semantics<parallel>], iteration_bounds = array<i64: 1>, scalar_prefetch = 0 : i64, scratch_operands = 0 : i64, tpu.core_type = #tpu.core_type<tc>, window_params = [{transform_indices = @transform_0, window_bounds = array<i64: 32, 32>}, {transform_indices = @transform_1, window_bounds = array<i64: 32, 8, 32>}, {transform_indices = @transform_2, window_bounds = array<i64: 32, 32>}, {transform_indices = @transform_3, window_bounds = array<i64: 32, 64>}]} {
    %c0 = arith.constant 0 : index
    %c0_0 = arith.constant 0 : index
    %0 = vector.load %arg1[%c0, %c0_0] : memref<32x32xbf16, #tpu.memory_space<vmem>>, vector<32x32xbf16>
    %c0_1 = arith.constant 0 : index
    %c0_2 = arith.constant 0 : index
    %c0_3 = arith.constant 0 : index
    %1 = vector.load %arg2[%c0_1, %c0_2, %c0_3] : memref<32x8x32xbf16, #tpu.memory_space<vmem>>, vector<32x8x32xbf16>
    %2 = vector.shape_cast %0 : vector<32x32xbf16> to vector<32x1x32xbf16>
    "tpu.trace_start"() <{level = 10 : i32, message = "bqh,bsh->bqs"}> : () -> ()
    %cst = arith.constant dense<0.000000e+00> : vector<32x1x8xf32>
    %3 = tpu.matmul %2, %1, %cst {dimension_numbers = #tpu.dot_dimension_numbers<[2], [2], [1], [1], [0, 0, 0, 1, 1, 1], [0], [0]>} : vector<32x1x32xbf16>, vector<32x8x32xbf16>, vector<32x1x8xf32> -> vector<32x1x8xf32>
    "tpu.trace_stop"() : () -> ()
    %4 = vector.shape_cast %3 : vector<32x1x8xf32> to vector<32x8xf32>
    %cst_4 = arith.constant 0.176776692 : f32
    %5 = vector.broadcast %cst_4 : f32 to vector<32x8xf32>
    %6 = arith.mulf %4, %5 : vector<32x8xf32>
    %cst_5 = arith.constant dense<0xFF800000> : vector<32xf32>
    %7 = vector.multi_reduction <maximumf>, %6, %cst_5 [1] : vector<32x8xf32> to vector<32xf32>
    %8 = vector.shape_cast %7 : vector<32xf32> to vector<32x1xf32>
    %9 = vector.broadcast %8 : vector<32x1xf32> to vector<32x8xf32>
    %10 = arith.subf %6, %9 : vector<32x8xf32>
    %11 = math.exp %10 : vector<32x8xf32>
    %cst_6 = arith.constant dense<0.000000e+00> : vector<32xf32>
    %12 = vector.multi_reduction <add>, %11, %cst_6 [1] : vector<32x8xf32> to vector<32xf32>
    %13 = vector.shape_cast %12 : vector<32xf32> to vector<32x1xf32>
    %14 = tpu.reciprocal %13 {approx = true} : vector<32x1xf32> -> vector<32x1xf32>
    %15 = vector.broadcast %14 : vector<32x1xf32> to vector<32x8xf32>
    %16 = arith.mulf %11, %15 : vector<32x8xf32>
    %17 = arith.truncf %16 : vector<32x8xf32> to vector<32x8xbf16>
    %18 = vector.shape_cast %17 : vector<32x8xbf16> to vector<32x1x8xbf16>
    "tpu.trace_start"() <{level = 10 : i32, message = "bqs,bsh->bqh"}> : () -> ()
    %cst_7 = arith.constant dense<0.000000e+00> : vector<32x1x32xf32>
    %19 = tpu.matmul %18, %1, %cst_7 {dimension_numbers = #tpu.dot_dimension_numbers<[2], [1], [1], [2], [0, 0, 0, 1, 1, 2], [0], [0]>} : vector<32x1x8xbf16>, vector<32x8x32xbf16>, vector<32x1x32xf32> -> vector<32x1x32xf32>
    "tpu.trace_stop"() : () -> ()
    %20 = vector.shape_cast %19 : vector<32x1x32xf32> to vector<32x32xf32>
    %c0_8 = arith.constant 0 : index
    %c0_9 = arith.constant 0 : index
    %21 = vector.load %arg3[%c0_8, %c0_9] : memref<32x32xbf16, #tpu.memory_space<vmem>>, vector<32x32xbf16>
    %22 = arith.truncf %20 : vector<32x32xf32> to vector<32x32xbf16>
    %23 = tpu.concatenate %21, %22 in 1 : vector<32x32xbf16>, vector<32x32xbf16> -> vector<32x64xbf16>
    %c0_10 = arith.constant 0 : index
    %c0_11 = arith.constant 0 : index
    %24 = vector.load %arg4[%c0_10, %c0_11] : memref<32x64xbf16, #tpu.memory_space<vmem>>, vector<32x64xbf16>
    tpu.vector_store %arg4[%c0_10, %c0_11], %23 {strides = array<i32>} : memref<32x64xbf16, #tpu.memory_space<vmem>>, vector<32x64xbf16>,
    return
  }
  func.func @transform_0(%arg0: i32) -> (i32, i32) {
    %c0_i32 = arith.constant 0 : i32
    %c0_i32_0 = arith.constant 0 : i32
    return %arg0, %c0_i32 : i32, i32
  }
  func.func @transform_1(%arg0: i32) -> (i32, i32, i32) {
    %c0_i32 = arith.constant 0 : i32
    %c0_i32_0 = arith.constant 0 : i32
    %c0_i32_1 = arith.constant 0 : i32
    return %arg0, %c0_i32, %c0_i32_0 : i32, i32, i32
  }
  func.func @transform_2(%arg0: i32) -> (i32, i32) {
    %c0_i32 = arith.constant 0 : i32
    %c0_i32_0 = arith.constant 0 : i32
    return %arg0, %c0_i32 : i32, i32
  }
  func.func @transform_3(%arg0: i32) -> (i32, i32) {
    %c0_i32 = arith.constant 0 : i32
    %c0_i32_0 = arith.constant 0 : i32
    return %arg0, %c0_i32 : i32, i32
  }
}

</mosaic_0001>

<bundles_post_ra>
// kernel: tpu_custom_call.1
= control target key start
LH: loop header
LB: loop body
LE: loop exit
PB: predicated region body
PF: predicated region fallthrough
CT: control target
= control target key end

     0   :  { %8 = vsyncpa [#allocation3], 0  ;;  %s5772_s0 = inlined_call_operand.hbm [shape: bf16[32,32], index: 0, kind: input, shape index: {}]   ;;  %s5773_s1 = inlined_call_operand.hbm [shape: bf16[32,8,32], index: 1, kind: input, shape index: {}]   ;;  %s5774_s2 = inlined_call_operand.hbm [shape: bf16[32,32], index: 2, kind: input, shape index: {}]   ;;  %s5775_s3 = inlined_call_operand.hbm [shape: bf16[32,64], index: 3, kind: output, shape index: {}]  }
   0x1   :  { %9 = vsyncpa [#allocation6], 0 }
   0x2   :  { %10 = vsyncpa [#allocation4], 0  ;;  %s4864_s12 = smov [#allocation5]   ;;  %s4865_s14 = smov [#allocation2]  }
   0x3   :  { %s28_s13 = sshll.u32 %s4864_s12, 4  ;;  %s16_s15 = sshll.u32 %s4865_s14, 4  ;;  %s29_s13 = int_to_ptr.vmem [resolvable:$true] %s28_s13  ;;  %s4894_s15 = int_to_ptr.vmem [resolvable:$true] %s16_s15 }
   0x4   :  { %s4770_s18 = scalar_lea.hbm %s5773_s1, 2048 }
   0x5   :  { %p4771_p0 = scmp.ne.s32.totalorder %s5773_s1, %s4770_s18  ;;  %p4774_p1 = scmp.lt.u32.totalorder %s4770_s18, %s5773_s1 }
   0x7   :  { %p4776_p2 = pnand %p4774_p1, %p4771_p0 }
   0x9   :  { %4779 = shalt.err (!%p4776_p2)
}
   0xa   :  { %s4780_s23 = scalar_lea.vmem %s29_s13, 2048  ;;  %p4785_p4 = scmp.lt.s32.totalorder %s29_s13, %s29_s13 }
   0xb   :  { %p4781_p3 = scmp.ne.s32.totalorder %s29_s13, %s4780_s23  ;;  %p4786_p5 = scmp.lt.s32.totalorder %s4780_s23, %s4780_s23 }
   0xd   :  { %p4787_p6 = por %p4786_p5, %p4785_p4 }
   0xf   :  { %p4788_p7 = pnand %p4787_p6, %p4781_p3 }
  0x11   :  { %4791 = shalt.err (!%p4788_p7)
}
  0x12   :  { %s4866_s24 = smov 64   ;;  %s4867_s25 = smov 4  }
  0x13   :  { %34 = dma.hbm_to_vmem [thread:$0]  %s5773_s1, 2048, %s29_s13, [#allocation6], %s4866_s24, %s4866_s24, %s4867_s25  }
  0x14   :  { %s4792_s30 = scalar_lea.hbm %s5772_s0, 256 }
  0x15   :  { %p4793_p8 = scmp.ne.s32.totalorder %s5772_s0, %s4792_s30  ;;  %p4796_p9 = scmp.lt.u32.totalorder %s4792_s30, %s5772_s0 }
  0x17   :  { %p4798_p10 = pnand %p4796_p9, %p4793_p8 }
  0x19   :  { %4801 = shalt.err (!%p4798_p10)
}
  0x1a   :  { %s4802_s8 = scalar_lea.vmem %s4894_s15, 256  ;;  %p4807_p12 = scmp.lt.s32.totalorder %s4894_s15, %s4894_s15 }
  0x1b   :  { %p4803_p11 = scmp.ne.s32.totalorder %s4894_s15, %s4802_s8  ;;  %p4808_p13 = scmp.lt.s32.totalorder %s4802_s8, %s4802_s8 }
  0x1d   :  { %p4809_p0 = por %p4808_p13, %p4807_p12 }
  0x1f   :  { %p4810_p1 = pnand %p4809_p0, %p4803_p11 }
  0x21   :  { %4813 = shalt.err (!%p4810_p1)
}
  0x22   :  { %22 = dma.hbm_to_vmem [thread:$0]  %s5772_s0, 256, %s4894_s15, [#allocation3], %s4866_s24, %s4866_s24, %s4867_s25  }
  0x23   :  { %s4868_s10 = smov [#allocation7]   ;;  %s4814_s14 = scalar_lea.hbm %s5774_s2, 256 }
  0x24   :  { %s40_s11 = sshll.u32 %s4868_s10, 4  ;;  %p4815_p2 = scmp.ne.s32.totalorder %s5774_s2, %s4814_s14  ;;  %s41_s11 = int_to_ptr.vmem [resolvable:$true] %s40_s11 }
  0x25   :  { %p4818_p3 = scmp.lt.u32.totalorder %s4814_s14, %s5774_s2 }
  0x27   :  { %p4820_p4 = pnand %p4818_p3, %p4815_p2 }
  0x29   :  { %4823 = shalt.err (!%p4820_p4)
}
  0x2a   :  { %s4824_s20 = scalar_lea.vmem %s41_s11, 256  ;;  %p4829_p6 = scmp.lt.s32.totalorder %s41_s11, %s41_s11 }
  0x2b   :  { %p4825_p5 = scmp.ne.s32.totalorder %s41_s11, %s4824_s20  ;;  %p4830_p7 = scmp.lt.s32.totalorder %s4824_s20, %s4824_s20 }
  0x2d   :  { %p4831_p8 = por %p4830_p7, %p4829_p6 }
  0x2f   :  { %p4832_p9 = pnand %p4831_p8, %p4825_p5 }
  0x31   :  { %4835 = shalt.err (!%p4832_p9)
}
  0x32   :  { %46 = dma.hbm_to_vmem [thread:$0]  %s5774_s2, 256, %s41_s11, [#allocation6], %s4866_s24, %s4866_s24, %s4867_s25  }
  0x33   :  { %4858 = dma.done.wait [#allocation3], 256  }
  0x34   :  { %4859 = vsyncadd [#allocation3], 4294967040 }
  0x35   :  { %4860 = dma.done.wait [#allocation6], 2304  }
  0x36   :  { %4861 = vsyncadd [#allocation6], 4294964992  ;;  %v4869_v0 = vmov 0.0   ;;  %v108_v1 = vlaneseq  ;;  %vm4870_vm0 = vmmov 0   ;;  %v4871_v2 = vmov 1966171168  }
  0x37   :  { %4272 = vmatprep.subr.bf16.mxu0 %v4869_v0  ;;  %4278 = vmatprep.subr.bf16.mxu1 %v4869_v0  ;;  %v106_v3 = vunpack.c.l.s4 %v4871_v2  ;;  %vm230_vm1 = vcmask 261120   ;;  %v4954_v7 = vld [vmem:[#allocation5] sm:$0xf]  ;;  %v4956_v8 = vld [vmem:[#allocation5 + $0x4] sm:$0xf]  ;;  %vm2401_vm2 = vcmask 1043456  }
  0x38   :  { %4274 = vmatprep.mubr.msk.bf16.mxu0 %vm4870_vm0, %v4869_v0  ;;  %4280 = vmatprep.mubr.msk.bf16.mxu1 %vm4870_vm0, %v4869_v0  ;;  %v109_v4 = vshrl.u32 %v108_v1, 7  ;;  %v235_v9 = vsel %vm230_vm1, %v4954_v7, 0  ;;  %v286_v10 = vsel %vm230_vm1, %v4956_v8, 0  ;;  %v63_v15 = vld [vmem:[#allocation5 + $0x8] sm:$0xf]  ;;  %vm1923_vm3 = vcmask 1041409  }
  0x39   :  { %v107_v5 = vunpack.c.0.s8 %v106_v3  ;;  %4273 = vmatpush3.bf16.xpose.msra.mxu0 %v235_v9  ;;  %4279 = vmatpush3.bf16.xpose.msra.mxu1 %v286_v10  ;;  %v4054_v11 = vld.sshfl [vmem:[#allocation2] sm:$0x33 pattern:$0x75316420]  ;;  %v64_v19 = vld [vmem:[#allocation5 + $0xc] sm:$0xf] }
  0x3a   :  { %v104_v12 = vcombine.high %v4054_v11, %v4054_v11  ;;  %v4963_v14 = vsub.s32 0, %v109_v4  ;;  %4284 = vmatprep.subr.bf16.mxu0 %v4869_v0  ;;  %4290 = vmatprep.subr.bf16.mxu1 %v4869_v0  ;;  %v337_v22 = vsel %vm230_vm1, %v63_v15, 0  ;;  %v388_v25 = vsel %vm230_vm1, %v64_v19, 0  ;;  %v65_v29 = vld [vmem:[#allocation5 + $0x10] sm:$0xf]  ;;  %s4872_s2 = smov 32  }
  0x3b   :  { %v4952_v6 = vsub.s32 %v107_v5, %v109_v4  ;;  %v66_v31 = vld [vmem:[#allocation5 + $0x14] sm:$0xf]  ;;  %v439_v33 = vsel %vm230_vm1, %v65_v29, 0  ;;  %v67_v36 = vld [vmem:[#allocation5 + $0x18] sm:$0xf]  ;;  %vm1926_vm4 = vcmask 1042434  }
  0x3c   :  { %v4056_v35 = vld.sshfl [vmem:[#allocation2 + $0x8] sm:$0x33 pattern:$0x75316420]  ;;  %v490_v37 = vsel %vm230_vm1, %v66_v31, 0  ;;  %v541_v48 = vsel %vm230_vm1, %v67_v36, 0 }
  0x3d   :  { %v111_v13 = vrot.slane %v4054_v11, %v4952_v6  ;;  %v118_v16 = vrot.slane %v104_v12, %v4952_v6  ;;  %v68_v39 = vld [vmem:[#allocation5 + $0x1c] sm:$0xf]  ;;  %v159_v40 = vrot.slane %v4056_v35, %v4952_v6  ;;  %v4990_v43 = vld.sshfl [vmem:[#allocation2 + $0x4] sm:$0x33 pattern:$0x75316420]  ;;  %v152_v46 = vcombine.high %v4056_v35, %v4056_v35 }
  0x3e   :  { %v592_v49 = vsel %vm230_vm1, %v68_v39, 0  ;;  %v5000_v51 = vrot.slane %v4990_v43, %v4952_v6  ;;  %v4057_v55 = vld.sshfl [vmem:[#allocation2 + $0xc] sm:$0x33 pattern:$0x75316420]  ;;  %vm1929_vm5 = vcmask 1043459  }
  0x3f   :  { %v4058_v17 = vpack.i.b16 %v111_v13, %v111_v13  ;;  %v194_v18 = vunpack.i.h.s16 %v111_v13  ;;  %v196_v23 = vunpack.i.h.s16 %v118_v16  ;;  %v4061_v26 = vpack.i.b16 %v118_v16, %v118_v16  ;;  %s4873_s21 = smov [#allocation8]  }
  0x40   :  { %v119_v28 = vcombine.high %v111_v13, %v111_v13  ;;  %v120_v42 = vcombine.high %v118_v16, %v118_v16  ;;  %v4082_v44 = vpack.i.b16 %v159_v40, %v159_v40  ;;  %v210_v45 = vunpack.i.h.s16 %v159_v40  ;;  %s4041_s22 = sshll.u32 %s4873_s21, 4  ;;  %s4042_s22 = int_to_ptr.vmem [resolvable:$true] %s4041_s22 }
  0x41   :  { %v229_v20 = vrot.slane %v4058_v17, %v4963_v14  ;;  %v277_v21 = vpack.i.b16 %v194_v18, %v194_v18  ;;  %v379_v27 = vpack.i.b16 %v196_v23, %v196_v23  ;;  %v332_v30 = vrot.slane %v4061_v26, %v4963_v14  ;;  %v69_v17 = vld [vmem:[#allocation5 + $0x20] sm:$0xf]  ;;  %v70_v23 = vld [vmem:[#allocation5 + $0x24] sm:$0xf]  ;;  %s4836_s23 = scalar_lea.vmem %s4042_s22, 256  ;;  %p4841_p11 = scmp.lt.s32.totalorder %s4042_s22, %s4042_s22 }
  0x42   :  { %v198_v34 = vunpack.i.h.s16 %v119_v28  ;;  %v4064_v38 = vpack.i.b16 %v119_v28, %v119_v28  ;;  %v167_v50 = vcombine.high %v159_v40, %v159_v40  ;;  %v5003_v52 = vrot.slane %v4082_v44, %v4963_v14  ;;  %p4837_p10 = scmp.ne.s32.totalorder %s4042_s22, %s4836_s23  ;;  %p4842_p12 = scmp.lt.s32.totalorder %s4836_s23, %s4836_s23 }
  0x43   :  { %4275 = vmatmul.mubr.msk.bf16.vlgmr.msra.gmra.mrb[0].mxu0 %vm230_vm1, %v229_v20  ;;  %v281_v24 = vrot.slane %v277_v21, %v4963_v14  ;;  %v383_v32 = vrot.slane %v379_v27, %v4963_v14  ;;  %v5005_v53 = vpack.i.b16 %v210_v45, %v210_v45  ;;  %v166_v54 = vrot.slane %v152_v46, %v4952_v6 }
  0x44   :  { %4285 = vmatpush3.bf16.xpose.msra.mxu0 %v337_v22  ;;  %4286 = vmatprep.mubr.msk.bf16.mxu0 %vm4870_vm0, %v4869_v0  ;;  %v481_v41 = vpack.i.b16 %v198_v34, %v198_v34  ;;  %v434_v47 = vrot.slane %v4064_v38, %v4963_v14  ;;  %v200_v57 = vunpack.i.h.s16 %v120_v42  ;;  %v4088_v58 = vpack.i.b16 %v167_v50, %v167_v50  ;;  %p4843_p13 = por %p4842_p12, %p4841_p11 }
  0x45   :  { %4281 = vmatmul.mubr.msk.bf16.vlgmr.msra.gmra.mrb[0].mxu1 %vm230_vm1, %v281_v24  ;;  %4296 = vmatprep.subr.bf16.mxu0 %v4869_v0  ;;  %v214_v59 = vunpack.i.h.s16 %v167_v50  ;;  %v1097_v60 = vrot.slane %v5005_v53, %v4963_v14  ;;  %v4085_v61 = vpack.i.b16 %v166_v54, %v166_v54  ;;  %v212_v62 = vunpack.i.h.s16 %v166_v54  ;;  %v83_v53 = vld [vmem:[#allocation5 + $0x58] sm:$0xf] }
  0x46   :  { %4291 = vmatpush3.bf16.xpose.msra.mxu1 %v388_v25  ;;  %4292 = vmatprep.mubr.msk.bf16.mxu1 %vm4870_vm0, %v4869_v0  ;;  %v485_v56 = vrot.slane %v481_v41, %v4963_v14  ;;  %v168_v63 = vcombine.high %v166_v54, %v166_v54  ;;  %v4067_v1 = vpack.i.b16 %v120_v42, %v120_v42  ;;  %v202_v18 = vunpack.i.h.s16 %v5000_v51  ;;  %p4844_p0 = pnand %p4843_p13, %p4837_p10 }
  0x47   :  { %4302 = vmatprep.subr.bf16.mxu1 %v4869_v0  ;;  %v5013_v2 = vrot.slane %v4088_v58, %v4963_v14  ;;  %v5015_v3 = vpack.i.b16 %v214_v59, %v214_v59  ;;  %v183_v4 = vrot.slane %v4057_v55, %v4952_v6  ;;  %v5021_v5 = vrot.slane %v4085_v61, %v4963_v14 }
  0x48   :  { %v5023_v9 = vpack.i.b16 %v212_v62, %v212_v62  ;;  %v4091_v10 = vpack.i.b16 %v168_v63, %v168_v63  ;;  %v216_v11 = vunpack.i.h.s16 %v168_v63  ;;  %v583_v12 = vpack.i.b16 %v200_v57, %v200_v57  ;;  %v72_v57 = vld [vmem:[#allocation5 + $0x2c] sm:$0xf] }
  0x49   :  { %v1301_v13 = vrot.slane %v5015_v3, %v4963_v14  ;;  %v4094_v15 = vpack.i.b16 %v183_v4, %v183_v4  ;;  %v218_v16 = vunpack.i.h.s16 %v183_v4  ;;  %v536_v22 = vrot.slane %v4067_v1, %v4963_v14  ;;  %v87_v3 = vld [vmem:[#allocation5 + $0x68] sm:$0xf] }
  0x4a   :  { %v1199_v19 = vrot.slane %v5023_v9, %v4963_v14  ;;  %v5035_v20 = vrot.slane %v4091_v10, %v4963_v14  ;;  %v5037_v21 = vpack.i.b16 %v216_v11, %v216_v11  ;;  %v176_v26 = vcombine.high %v4057_v55, %v4057_v55  ;;  %v73_v11 = vld [vmem:[#allocation5 + $0x30] sm:$0xf]  ;;  %v85_v9 = vld [vmem:[#allocation5 + $0x60] sm:$0xf] }
  0x4b   :  { %4287 = vmatmul.mubr.msk.bf16.vlgmr.msra.gmra.mrb[4].mxu0 %vm230_vm1, %v332_v30  ;;  %v5042_v24 = vrot.slane %v4094_v15, %v4963_v14  ;;  %v5044_v25 = vpack.i.b16 %v218_v16, %v218_v16  ;;  %v128_v27 = vcombine.high %v4990_v43, %v4990_v43  ;;  %v191_v29 = vcombine.high %v183_v4, %v183_v4  ;;  %v74_v15 = vld [vmem:[#allocation5 + $0x34] sm:$0xf] }
  0x4c   :  { %4297 = vmatpush3.bf16.xpose.msra.mxu0 %v439_v33  ;;  %4298 = vmatprep.mubr.msk.bf16.mxu0 %vm4870_vm0, %v4869_v0  ;;  %v1403_v28 = vrot.slane %v5037_v21, %v4963_v14  ;;  %v587_v30 = vrot.slane %v583_v12, %v4963_v14  ;;  %v643_v31 = vsel %vm230_vm1, %v69_v17, 0  ;;  %v190_v33 = vrot.slane %v176_v26, %v4952_v6  ;;  %v89_v21 = vld [vmem:[#allocation5 + $0x70] sm:$0xf] }
  0x4d   :  { %4293 = vmatmul.mubr.msk.bf16.vlgmr.msra.gmra.mrb[4].mxu1 %vm230_vm1, %v383_v32  ;;  %4308 = vmatprep.subr.bf16.mxu0 %v4869_v0  ;;  %v1505_v32 = vrot.slane %v5044_v25, %v4963_v14  ;;  %v694_v34 = vsel %vm230_vm1, %v70_v23, 0  ;;  %v4070_v35 = vpack.i.b16 %v5000_v51, %v5000_v51  ;;  %v4100_v36 = vpack.i.b16 %v191_v29, %v191_v29  ;;  %v91_v25 = vld [vmem:[#allocation5 + $0x78] sm:$0xf] }
  0x4e   :  { %4303 = vmatpush3.bf16.xpose.msra.mxu1 %v490_v37  ;;  %4304 = vmatprep.mubr.msk.bf16.mxu1 %vm4870_vm0, %v4869_v0  ;;  %v222_v37 = vunpack.i.h.s16 %v191_v29  ;;  %v685_v38 = vpack.i.b16 %v202_v18, %v202_v18  ;;  %v4097_v39 = vpack.i.b16 %v190_v33, %v190_v33  ;;  %v220_v40 = vunpack.i.h.s16 %v190_v33 }
  0x4f   :  { %4314 = vmatprep.subr.bf16.mxu1 %v4869_v0  ;;  %v192_v41 = vcombine.high %v190_v33, %v190_v33  ;;  %v142_v42 = vrot.slane %v128_v27, %v4952_v6  ;;  %v5063_v43 = vrot.slane %v4100_v36, %v4963_v14  ;;  %v71_v6 = vld [vmem:[#allocation5 + $0x28] sm:$0xf]  ;;  %v638_v50 = vrot.slane %v4070_v35, %v4963_v14  ;;  %v75_v27 = vld [vmem:[#allocation5 + $0x38] sm:$0xf] }
  0x50   :  { %v5065_v44 = vpack.i.b16 %v222_v37, %v222_v37  ;;  %v5070_v45 = vrot.slane %v4097_v39, %v4963_v14  ;;  %v5072_v46 = vpack.i.b16 %v220_v40, %v220_v40  ;;  %v689_v58 = vrot.slane %v685_v38, %v4963_v14  ;;  %v77_v38 = vld [vmem:[#allocation5 + $0x40] sm:$0xf]  ;;  %v78_v40 = vld [vmem:[#allocation5 + $0x44] sm:$0xf] }
  0x51   :  { %v745_v59 = vsel %vm230_vm1, %v71_v6, 0  ;;  %v204_v61 = vunpack.i.h.s16 %v142_v42  ;;  %v796_v63 = vsel %vm230_vm1, %v72_v57, 0  ;;  %v4073_v1 = vpack.i.b16 %v142_v42, %v142_v42  ;;  %v80_v6 = vld [vmem:[#allocation5 + $0x4c] sm:$0xf] }
  0x52   :  { %v1607_v54 = vrot.slane %v5072_v46, %v4963_v14  ;;  %v143_v10 = vcombine.high %v5000_v51, %v5000_v51  ;;  %v847_v17 = vsel %vm230_vm1, %v73_v11, 0  ;;  %v144_v26 = vcombine.high %v142_v42, %v142_v42 }
  0x53   :  { %4299 = vmatmul.mubr.msk.bf16.vlgmr.msra.gmra.mrb[8].mxu0 %vm230_vm1, %v434_v47  ;;  %v4103_v47 = vpack.i.b16 %v192_v41, %v192_v41  ;;  %v787_v4 = vpack.i.b16 %v204_v61, %v204_v61  ;;  %v740_v12 = vrot.slane %v4073_v1, %v4963_v14  ;;  %v949_v33 = vsel %vm230_vm1, %v75_v27, 0 }
  0x54   :  { %4309 = vmatpush3.bf16.xpose.msra.mxu0 %v541_v48  ;;  %4310 = vmatprep.mubr.msk.bf16.mxu0 %vm4870_vm0, %v4869_v0  ;;  %v224_v48 = vunpack.i.h.s16 %v192_v41  ;;  %v206_v18 = vunpack.i.h.s16 %v143_v10  ;;  %v4076_v51 = vpack.i.b16 %v143_v10, %v143_v10  ;;  %v4079_v36 = vpack.i.b16 %v144_v26, %v144_v26 }
  0x55   :  { %4305 = vmatmul.mubr.msk.bf16.vlgmr.msra.gmra.mrb[8].mxu1 %vm230_vm1, %v485_v56  ;;  %4320 = vmatprep.subr.bf16.mxu0 %v4869_v0  ;;  %v5083_v55 = vrot.slane %v4103_v47, %v4963_v14  ;;  %v791_v16 = vrot.slane %v787_v4, %v4963_v14  ;;  %v1051_v42 = vsel %vm230_vm1, %v77_v38, 0  ;;  %v1102_v47 = vsel %vm230_vm1, %v78_v40, 0 }
  0x56   :  { %4315 = vmatpush3.bf16.xpose.msra.mxu1 %v592_v49  ;;  %4316 = vmatprep.mubr.msk.bf16.mxu1 %vm4870_vm0, %v4869_v0  ;;  %v1709_v49 = vrot.slane %v5065_v44, %v4963_v14  ;;  %v5085_v56 = vpack.i.b16 %v224_v48, %v224_v48  ;;  %v889_v23 = vpack.i.b16 %v206_v18, %v206_v18  ;;  %v79_v48 = vld [vmem:[#allocation5 + $0x48] sm:$0xf]  ;;  %v1204_v57 = vsel %vm230_vm1, %v80_v6, 0 }
  0x57   :  { %4326 = vmatprep.subr.bf16.mxu1 %v4869_v0  ;;  %v842_v29 = vrot.slane %v4076_v51, %v4963_v14  ;;  %v944_v39 = vrot.slane %v4079_v36, %v4963_v14  ;;  %v2447_v46 = vsel %vm2401_vm2, %v4956_v8, 0  ;;  %vm1932_vm6 = vcmask 1044484  }
  0x58   :  { %v1811_v62 = vrot.slane %v5085_v56, %v4963_v14  ;;  %vm1935_vm7 = vcmask 1045509   ;;  %vm1938_vm8 = vcmask 1046534   ;;  %vm1941_vm9 = vcmask 1047559  }
  0x59   :  { %vm1989_vm10 = vcmask 64512   ;;  %vm4031_vm11 = vcmask 519168  }
  0x5b   :  { %4311 = vmatmul.mubr.msk.bf16.vlgmr.msra.gmra.mrb[12].mxu0 %vm230_vm1, %v536_v22  ;;  %v898_v22 = vsel %vm230_vm1, %v74_v15, 0 }
  0x5c   :  { %4321 = vmatpush3.bf16.xpose.msra.mxu0 %v643_v31  ;;  %4322 = vmatprep.mubr.msk.bf16.mxu0 %vm4870_vm0, %v4869_v0  ;;  %v893_v31 = vrot.slane %v889_v23, %v4963_v14 }
  0x5d   :  { %4317 = vmatmul.mubr.msk.bf16.vlgmr.msra.gmra.mrb[12].mxu1 %vm230_vm1, %v587_v30  ;;  %4332 = vmatprep.subr.bf16.mxu0 %v4869_v0  ;;  %v76_v30 = vld [vmem:[#allocation5 + $0x3c] sm:$0xf] }
  0x5e   :  { %4327 = vmatpush3.bf16.xpose.msra.mxu1 %v694_v34  ;;  %4328 = vmatprep.mubr.msk.bf16.mxu1 %vm4870_vm0, %v4869_v0  ;;  %v208_v34 = vunpack.i.h.s16 %v144_v26  ;;  %v1000_v35 = vsel %vm230_vm1, %v76_v30, 0 }
  0x5f   :  { %4338 = vmatprep.subr.bf16.mxu1 %v4869_v0 }
  0x60   :  { %v991_v37 = vpack.i.b16 %v208_v34, %v208_v34 }
  0x62   :  { %v995_v41 = vrot.slane %v991_v37, %v4963_v14 }
  0x63   :  { %4323 = vmatmul.mubr.msk.bf16.vlgmr.msra.gmra.mrb[16].mxu0 %vm230_vm1, %v638_v50  ;;  %v1153_v50 = vsel %vm230_vm1, %v79_v48, 0 }
  0x64   :  { %4333 = vmatpush3.bf16.xpose.msra.mxu0 %v745_v59  ;;  %4334 = vmatprep.mubr.msk.bf16.mxu0 %vm4870_vm0, %v4869_v0 }
  0x65   :  { %4329 = vmatmul.mubr.msk.bf16.vlgmr.msra.gmra.mrb[16].mxu1 %vm230_vm1, %v689_v58  ;;  %4344 = vmatprep.subr.bf16.mxu0 %v4869_v0  ;;  %v81_v58 = vld [vmem:[#allocation5 + $0x50] sm:$0xf] }
  0x66   :  { %4339 = vmatpush3.bf16.xpose.msra.mxu1 %v796_v63  ;;  %4340 = vmatprep.mubr.msk.bf16.mxu1 %vm4870_vm0, %v4869_v0  ;;  %v1255_v59 = vsel %vm230_vm1, %v81_v58, 0 }
  0x67   :  { %4350 = vmatprep.subr.bf16.mxu1 %v4869_v0 }
  0x6b   :  { %4335 = vmatmul.mubr.msk.bf16.vlgmr.msra.gmra.mrb[20].mxu0 %vm230_vm1, %v740_v12 }
  0x6c   :  { %4345 = vmatpush3.bf16.xpose.msra.mxu0 %v847_v17  ;;  %4346 = vmatprep.mubr.msk.bf16.mxu0 %vm4870_vm0, %v4869_v0 }
  0x6d   :  { %4341 = vmatmul.mubr.msk.bf16.vlgmr.msra.gmra.mrb[20].mxu1 %vm230_vm1, %v791_v16  ;;  %4356 = vmatprep.subr.bf16.mxu0 %v4869_v0 }
  0x6e   :  { %4351 = vmatpush3.bf16.xpose.msra.mxu1 %v898_v22  ;;  %4352 = vmatprep.mubr.msk.bf16.mxu1 %vm4870_vm0, %v4869_v0 }
  0x6f   :  { %4362 = vmatprep.subr.bf16.mxu1 %v4869_v0 }
  0x73   :  { %4347 = vmatmul.mubr.msk.bf16.vlgmr.msra.gmra.mrb[24].mxu0 %vm230_vm1, %v842_v29 }
  0x74   :  { %4357 = vmatpush3.bf16.xpose.msra.mxu0 %v949_v33  ;;  %4358 = vmatprep.mubr.msk.bf16.mxu0 %vm4870_vm0, %v4869_v0 }
  0x75   :  { %4353 = vmatmul.mubr.msk.bf16.vlgmr.msra.gmra.mrb[24].mxu1 %vm230_vm1, %v893_v31  ;;  %4368 = vmatprep.subr.bf16.mxu0 %v4869_v0 }
  0x76   :  { %4363 = vmatpush3.bf16.xpose.msra.mxu1 %v1000_v35  ;;  %4364 = vmatprep.mubr.msk.bf16.mxu1 %vm4870_vm0, %v4869_v0 }
  0x77   :  { %4374 = vmatprep.subr.bf16.mxu1 %v4869_v0 }
  0x7b   :  { %4359 = vmatmul.mubr.msk.bf16.vlgmr.msra.gmra.mrb[28].mxu0 %vm230_vm1, %v944_v39 }
  0x7c   :  { %4369 = vmatpush3.bf16.xpose.msra.mxu0 %v1051_v42  ;;  %4370 = vmatprep.mubr.msk.bf16.mxu0 %vm4870_vm0, %v4869_v0 }
  0x7d   :  { %4365 = vmatmul.mubr.msk.bf16.vlgmr.msra.gmra.mrb[28].mxu1 %vm230_vm1, %v995_v41  ;;  %4380 = vmatprep.subr.bf16.mxu0 %v4869_v0 }
  0x7e   :  { %4375 = vmatpush3.bf16.xpose.msra.mxu1 %v1102_v47  ;;  %4376 = vmatprep.mubr.msk.bf16.mxu1 %vm4870_vm0, %v4869_v0 }
  0x7f   :  { %4386 = vmatprep.subr.bf16.mxu1 %v4869_v0 }
  0x83   :  { %4371 = vmatmul.mubr.msk.bf16.vlgmr.msra.gmra.mrb[32].mxu0 %vm230_vm1, %v5003_v52  ;;  %v82_v52 = vld [vmem:[#allocation5 + $0x54] sm:$0xf] }
  0x84   :  { %4381 = vmatpush3.bf16.xpose.msra.mxu0 %v1153_v50  ;;  %4382 = vmatprep.mubr.msk.bf16.mxu0 %vm4870_vm0, %v4869_v0  ;;  %v1306_v61 = vsel %vm230_vm1, %v82_v52, 0 }
  0x85   :  { %4377 = vmatmul.mubr.msk.bf16.vlgmr.msra.gmra.mrb[32].mxu1 %vm230_vm1, %v1097_v60  ;;  %4392 = vmatprep.subr.bf16.mxu0 %v4869_v0  ;;  %v84_v60 = vld [vmem:[#allocation5 + $0x5c] sm:$0xf] }
  0x86   :  { %4387 = vmatpush3.bf16.xpose.msra.mxu1 %v1204_v57  ;;  %4388 = vmatprep.mubr.msk.bf16.mxu1 %vm4870_vm0, %v4869_v0  ;;  %v1408_v63 = vsel %vm230_vm1, %v84_v60, 0 }
  0x87   :  { %4398 = vmatprep.subr.bf16.mxu1 %v4869_v0 }
  0x8b   :  { %4383 = vmatmul.mubr.msk.bf16.vlgmr.msra.gmra.mrb[36].mxu0 %vm230_vm1, %v5021_v5  ;;  %v1357_v5 = vsel %vm230_vm1, %v83_v53, 0 }
  0x8c   :  { %4393 = vmatpush3.bf16.xpose.msra.mxu0 %v1255_v59  ;;  %4394 = vmatprep.mubr.msk.bf16.mxu0 %vm4870_vm0, %v4869_v0 }
  0x8d   :  { %4389 = vmatmul.mubr.msk.bf16.vlgmr.msra.gmra.mrb[36].mxu1 %vm230_vm1, %v1199_v19  ;;  %4404 = vmatprep.subr.bf16.mxu0 %v4869_v0  ;;  %v1459_v19 = vsel %vm230_vm1, %v85_v9, 0 }
  0x8e   :  { %4399 = vmatpush3.bf16.xpose.msra.mxu1 %v1306_v61  ;;  %4400 = vmatprep.mubr.msk.bf16.mxu1 %vm4870_vm0, %v4869_v0 }
  0x8f   :  { %4410 = vmatprep.subr.bf16.mxu1 %v4869_v0 }
  0x93   :  { %4395 = vmatmul.mubr.msk.bf16.vlgmr.msra.gmra.mrb[40].mxu0 %vm230_vm1, %v5013_v2  ;;  %v86_v2 = vld [vmem:[#allocation5 + $0x64] sm:$0xf] }
  0x94   :  { %4405 = vmatpush3.bf16.xpose.msra.mxu0 %v1357_v5  ;;  %4406 = vmatprep.mubr.msk.bf16.mxu0 %vm4870_vm0, %v4869_v0  ;;  %v1510_v1 = vsel %vm230_vm1, %v86_v2, 0 }
  0x95   :  { %4401 = vmatmul.mubr.msk.bf16.vlgmr.msra.gmra.mrb[40].mxu1 %vm230_vm1, %v1301_v13  ;;  %4416 = vmatprep.subr.bf16.mxu0 %v4869_v0  ;;  %v88_v13 = vld [vmem:[#allocation5 + $0x6c] sm:$0xf] }
  0x96   :  { %4411 = vmatpush3.bf16.xpose.msra.mxu1 %v1408_v63  ;;  %4412 = vmatprep.mubr.msk.bf16.mxu1 %vm4870_vm0, %v4869_v0  ;;  %v1612_v4 = vsel %vm230_vm1, %v88_v13, 0 }
  0x97   :  { %4422 = vmatprep.subr.bf16.mxu1 %v4869_v0 }
  0x9b   :  { %4407 = vmatmul.mubr.msk.bf16.vlgmr.msra.gmra.mrb[44].mxu0 %vm230_vm1, %v5035_v20  ;;  %v1561_v20 = vsel %vm230_vm1, %v87_v3, 0 }
  0x9c   :  { %4417 = vmatpush3.bf16.xpose.msra.mxu0 %v1459_v19  ;;  %4418 = vmatprep.mubr.msk.bf16.mxu0 %vm4870_vm0, %v4869_v0 }
  0x9d   :  { %4413 = vmatmul.mubr.msk.bf16.vlgmr.msra.gmra.mrb[44].mxu1 %vm230_vm1, %v1403_v28  ;;  %4428 = vmatprep.subr.bf16.mxu0 %v4869_v0  ;;  %v1663_v28 = vsel %vm230_vm1, %v89_v21, 0 }
  0x9e   :  { %4423 = vmatpush3.bf16.xpose.msra.mxu1 %v1510_v1  ;;  %4424 = vmatprep.mubr.msk.bf16.mxu1 %vm4870_vm0, %v4869_v0 }
  0x9f   :  { %4434 = vmatprep.subr.bf16.mxu1 %v4869_v0 }
  0xa3   :  { %4419 = vmatmul.mubr.msk.bf16.vlgmr.msra.gmra.mrb[48].mxu0 %vm230_vm1, %v5042_v24  ;;  %v90_v24 = vld [vmem:[#allocation5 + $0x74] sm:$0xf] }
  0xa4   :  { %4429 = vmatpush3.bf16.xpose.msra.mxu0 %v1561_v20  ;;  %4430 = vmatprep.mubr.msk.bf16.mxu0 %vm4870_vm0, %v4869_v0  ;;  %v1714_v10 = vsel %vm230_vm1, %v90_v24, 0 }
  0xa5   :  { %4425 = vmatmul.mubr.msk.bf16.vlgmr.msra.gmra.mrb[48].mxu1 %vm230_vm1, %v1505_v32  ;;  %4440 = vmatprep.subr.bf16.mxu0 %v4869_v0  ;;  %v92_v32 = vld [vmem:[#allocation5 + $0x7c] sm:$0xf] }
  0xa6   :  { %4435 = vmatpush3.bf16.xpose.msra.mxu1 %v1612_v4  ;;  %4436 = vmatprep.mubr.msk.bf16.mxu1 %vm4870_vm0, %v4869_v0  ;;  %v1816_v11 = vsel %vm230_vm1, %v92_v32, 0 }
  0xa7   :  { %4446 = vmatprep.subr.bf16.mxu1 %v4869_v0 }
  0xab   :  { %4431 = vmatmul.mubr.msk.bf16.vlgmr.msra.gmra.mrb[52].mxu0 %vm230_vm1, %v5070_v45  ;;  %v1765_v45 = vsel %vm230_vm1, %v91_v25, 0 }
  0xac   :  { %4441 = vmatpush3.bf16.xpose.msra.mxu0 %v1663_v28  ;;  %4442 = vmatprep.mubr.msk.bf16.mxu0 %vm4870_vm0, %v4869_v0 }
  0xad   :  { %4437 = vmatmul.mubr.msk.bf16.vlgmr.msra.gmra.mrb[52].mxu1 %vm230_vm1, %v1607_v54  ;;  %4452 = vmatprep.subr.bf16.mxu0 %v4869_v0 }
  0xae   :  { %4447 = vmatpush3.bf16.xpose.msra.mxu1 %v1714_v10  ;;  %4448 = vmatprep.mubr.msk.bf16.mxu1 %vm4870_vm0, %v4869_v0 }
  0xaf   :  { %4458 = vmatprep.subr.bf16.mxu1 %v4869_v0 }
  0xb3   :  { %4443 = vmatmul.mubr.msk.bf16.vlgmr.msra.gmra.mrb[56].mxu0 %vm230_vm1, %v5063_v43  ;;  %v2402_v43 = vsel %vm2401_vm2, %v4954_v7, 0 }
  0xb4   :  { %4453 = vmatpush3.bf16.xpose.msra.mxu0 %v1765_v45  ;;  %4454 = vmatprep.mubr.msk.bf16.mxu0 %vm4870_vm0, %v4869_v0 }
  0xb5   :  { %4449 = vmatmul.mubr.msk.bf16.vlgmr.msra.gmra.mrb[56].mxu1 %vm230_vm1, %v1709_v49  ;;  %4464 = vmatprep.subr.bf16.mxu0 %v4869_v0 }
  0xb6   :  { %4459 = vmatpush3.bf16.xpose.msra.mxu1 %v1816_v11  ;;  %4460 = vmatprep.mubr.msk.bf16.mxu1 %vm4870_vm0, %v4869_v0 }
  0xb7   :  { %4470 = vmatprep.subr.bf16.mxu1 %v4869_v0 }
  0xbb   :  { %4455 = vmatmul.mubr.msk.bf16.vlgmr.msra.gmra.mrb[60].mxu0 %vm230_vm1, %v5083_v55 }
  0xbc   :  { %4465 = vmatpush3.bf16.msra.mxu0 %v2402_v43  ;;  %4466 = vmatprep.mubr.msk.bf16.mxu0 %vm4870_vm0, %v4869_v0 }
  0xbd   :  { %4461 = vmatmul.mubr.msk.bf16.vlgmr.msra.gmra.mrb[60].mxu1 %vm230_vm1, %v1811_v62  ;;  %4476 = vmatprep.subr.bf16.mxu0 %v4869_v0 }
  0xbe   :  { %4471 = vmatpush3.bf16.msra.mxu1 %v2447_v46  ;;  %4472 = vmatprep.mubr.msk.bf16.mxu1 %vm4870_vm0, %v4869_v0 }
  0xbf   :  { %4482 = vmatprep.subr.bf16.mxu1 %v4869_v0 }
 0x116   :  { %v271_v7 = vpop.f32.mrb[0].mxu0 }
 0x117   :  { %v4276_v8 = vpop.f32.mrb[1].mxu0  ;;  %v5262_v35 = vmul.f32 0.17677669, %v271_v7 }
 0x118   :  { %v322_v44 = vpop.f32.mrb[0].mxu1  ;;  %v274_v49 = vpop.f32.mrb[2].mxu0 }
 0x119   :  { %v4282_v54 = vpop.f32.mrb[1].mxu1  ;;  %v4277_v55 = vpop.f32.mrb[3].mxu0  ;;  %v5252_v22 = vmul.f32 0.17677669, %v322_v44 }
 0x11a   :  { %v325_v12 = vpop.f32.mrb[2].mxu1 }
 0x11b   :  { %v4283_v15 = vpop.f32.mrb[3].mxu1  ;;  %v1922_v27 = vrot.slane %v5252_v22, 7 }
 0x11d   :  { %v1924_v40 = vsel %vm1923_vm3, %v1922_v27, %v5262_v35 }
 0x11e   :  { %v373_v16 = vpop.f32.mrb[4].mxu0 }
 0x11f   :  { %v4288_v14 = vpop.f32.mrb[5].mxu0  ;;  %v5254_v23 = vmul.f32 0.17677669, %v373_v16 }
 0x120   :  { %v424_v56 = vpop.f32.mrb[4].mxu1  ;;  %v376_v62 = vpop.f32.mrb[6].mxu0 }
 0x121   :  { %v4294_v17 = vpop.f32.mrb[5].mxu1  ;;  %v4289_v18 = vpop.f32.mrb[7].mxu0  ;;  %v5257_v29 = vmul.f32 0.17677669, %v424_v56  ;;  %v1925_v31 = vrot.slane %v5254_v23, 6 }
 0x122   :  { %v427_v51 = vpop.f32.mrb[6].mxu1 }
 0x123   :  { %v4295_v26 = vpop.f32.mrb[7].mxu1  ;;  %v1928_v41 = vrot.slane %v5257_v29, 5  ;;  %v1927_v48 = vsel %vm1926_vm4, %v1925_v31, %v1924_v40 }
 0x125   :  { %v1930_v57 = vsel %vm1929_vm5, %v1928_v41, %v1927_v48 }
 0x126   :  { %v475_v30 = vpop.f32.mrb[8].mxu0 }
 0x127   :  { %v5260_v33 = vmul.f32 0.17677669, %v475_v30  ;;  %v4300_v34 = vpop.f32.mrb[9].mxu0 }
 0x128   :  { %v526_v36 = vpop.f32.mrb[8].mxu1  ;;  %v478_v37 = vpop.f32.mrb[10].mxu0 }
 0x129   :  { %v4306_v38 = vpop.f32.mrb[9].mxu1  ;;  %v4301_v39 = vpop.f32.mrb[11].mxu0  ;;  %v5267_v42 = vmul.f32 0.17677669, %v526_v36  ;;  %v1931_v6 = vrot.slane %v5260_v33, 4 }
 0x12a   :  { %v529_v47 = vpop.f32.mrb[10].mxu1 }
 0x12b   :  { %v4307_v50 = vpop.f32.mrb[11].mxu1  ;;  %v1934_v58 = vrot.slane %v5267_v42, 3  ;;  %v1933_v59 = vsel %vm1932_vm6, %v1931_v6, %v1930_v57 }
 0x12d   :  { %v1936_v3 = vsel %vm1935_vm7, %v1934_v58, %v1933_v59 }
 0x12e   :  { %v577_v52 = vpop.f32.mrb[12].mxu0 }
 0x12f   :  { %v5274_v61 = vmul.f32 0.17677669, %v577_v52  ;;  %v4312_v53 = vpop.f32.mrb[13].mxu0 }
 0x130   :  { %v628_v60 = vpop.f32.mrb[12].mxu1  ;;  %v580_v5 = vpop.f32.mrb[14].mxu0 }
 0x131   :  { %v1937_v63 = vrot.slane %v5274_v61, 2  ;;  %v5277_v9 = vmul.f32 0.17677669, %v628_v60  ;;  %v4318_v2 = vpop.f32.mrb[13].mxu1  ;;  %v4313_v19 = vpop.f32.mrb[15].mxu0 }
 0x132   :  { %v631_v1 = vpop.f32.mrb[14].mxu1 }
 0x133   :  { %v1940_v13 = vrot.slane %v5277_v9, 1  ;;  %v4319_v20 = vpop.f32.mrb[15].mxu1  ;;  %v1939_v4 = vsel %vm1938_vm8, %v1937_v63, %v1936_v3 }
 0x135   :  { %v1942_v21 = vsel %vm1941_vm9, %v1940_v13, %v1939_v4 }
 0x136   :  { %v679_v24 = vpop.f32.mrb[16].mxu0  ;;  %v1990_v28 = vsel %vm1989_vm10, %v1942_v21, -inf }
 0x137   :  { %1991 = vmax.xlane.f32.xlu0 %v1990_v28  ;;  %v4324_v10 = vpop.f32.mrb[17].mxu0  ;;  %v5294_v27 = vmul.f32 0.17677669, %v679_v24 }
 0x138   :  { %v730_v25 = vpop.f32.mrb[16].mxu1  ;;  %v682_v32 = vpop.f32.mrb[18].mxu0 }
 0x139   :  { %v4330_v45 = vpop.f32.mrb[17].mxu1  ;;  %v4325_v11 = vpop.f32.mrb[19].mxu0  ;;  %v5284_v12 = vmul.f32 0.17677669, %v730_v25 }
 0x13a   :  { %v733_v43 = vpop.f32.mrb[18].mxu1 }
 0x13b   :  { %v4331_v46 = vpop.f32.mrb[19].mxu1  ;;  %v1943_v56 = vrot.slane %v5284_v12, 7 }
 0x13d   :  { %v1944_v37 = vsel %vm1923_vm3, %v1943_v56, %v5294_v27 }
 0x13e   :  { %v781_v7 = vpop.f32.mrb[20].mxu0 }
 0x13f   :  { %v4336_v8 = vpop.f32.mrb[21].mxu0  ;;  %v5286_v16 = vmul.f32 0.17677669, %v781_v7 }
 0x140   :  { %v832_v44 = vpop.f32.mrb[20].mxu1  ;;  %v784_v49 = vpop.f32.mrb[22].mxu0 }
 0x141   :  { %v4342_v54 = vpop.f32.mrb[21].mxu1  ;;  %v4337_v55 = vpop.f32.mrb[23].mxu0  ;;  %v5289_v62 = vmul.f32 0.17677669, %v832_v44  ;;  %v1945_v18 = vrot.slane %v5286_v16, 6 }
 0x142   :  { %v835_v15 = vpop.f32.mrb[22].mxu1 }
 0x143   :  { %v4343_v14 = vpop.f32.mrb[23].mxu1  ;;  %v1947_v38 = vrot.slane %v5289_v62, 5  ;;  %v1946_v41 = vsel %vm1926_vm4, %v1945_v18, %v1944_v37 }
 0x145   :  { %v1948_v6 = vsel %vm1929_vm5, %v1947_v38, %v1946_v41 }
 0x146   :  { %v883_v17 = vpop.f32.mrb[24].mxu0 }
 0x147   :  { %v5292_v51 = vmul.f32 0.17677669, %v883_v17  ;;  %v4348_v26 = vpop.f32.mrb[25].mxu0 }
 0x148   :  { %v934_v30 = vpop.f32.mrb[24].mxu1  ;;  %v886_v31 = vpop.f32.mrb[26].mxu0 }
 0x149   :  { %v4354_v34 = vpop.f32.mrb[25].mxu1  ;;  %v4349_v36 = vpop.f32.mrb[27].mxu0  ;;  %v5299_v39 = vmul.f32 0.17677669, %v934_v30  ;;  %v1949_v47 = vrot.slane %v5292_v51, 4 }
 0x14a   :  { %v937_v40 = vpop.f32.mrb[26].mxu1 }
 0x14b   :  { %v4355_v48 = vpop.f32.mrb[27].mxu1  ;;  %v1951_v50 = vrot.slane %v5299_v39, 3  ;;  %v1950_v58 = vsel %vm1932_vm6, %v1949_v47, %v1948_v6 }
 0x14d   :  { %v1952_v3 = vsel %vm1935_vm7, %v1951_v50, %v1950_v58 }
 0x14e   :  { %v985_v57 = vpop.f32.mrb[28].mxu0 }
 0x14f   :  { %v5306_v52 = vmul.f32 0.17677669, %v985_v57  ;;  %v4360_v59 = vpop.f32.mrb[29].mxu0 }
 0x150   :  { %v1036_v53 = vpop.f32.mrb[28].mxu1  ;;  %v988_v60 = vpop.f32.mrb[30].mxu0 }
 0x151   :  { %v1953_v5 = vrot.slane %v5306_v52, 2  ;;  %v5309_v63 = vmul.f32 0.17677669, %v1036_v53  ;;  %v4366_v2 = vpop.f32.mrb[29].mxu1  ;;  %v4361_v19 = vpop.f32.mrb[31].mxu0 }
 0x152   :  { %v1039_v1 = vpop.f32.mrb[30].mxu1 }
 0x153   :  { %v1955_v13 = vrot.slane %v5309_v63, 1  ;;  %v4367_v20 = vpop.f32.mrb[31].mxu1  ;;  %v1954_v4 = vsel %vm1938_vm8, %v1953_v5, %v1952_v3 }
 0x155   :  { %v1956_v21 = vsel %vm1941_vm9, %v1955_v13, %v1954_v4 }
 0x156   :  { %v1087_v24 = vpop.f32.mrb[32].mxu0  ;;  %v1993_v28 = vsel %vm1989_vm10, %v1956_v21, -inf }
 0x157   :  { %1994 = vmax.xlane.f32.xlu0 %v1993_v28  ;;  %v4372_v10 = vpop.f32.mrb[33].mxu0  ;;  %v5326_v37 = vmul.f32 0.17677669, %v1087_v24 }
 0x158   :  { %v1138_v25 = vpop.f32.mrb[32].mxu1  ;;  %v1090_v32 = vpop.f32.mrb[34].mxu0 }
 0x159   :  { %v4378_v45 = vpop.f32.mrb[33].mxu1  ;;  %v4373_v11 = vpop.f32.mrb[35].mxu0  ;;  %v5316_v15 = vmul.f32 0.17677669, %v1138_v25 }
 0x15a   :  { %v1141_v43 = vpop.f32.mrb[34].mxu1 }
 0x15b   :  { %v4379_v46 = vpop.f32.mrb[35].mxu1  ;;  %v1957_v18 = vrot.slane %v5316_v15, 7 }
 0x15d   :  { %v1958_v48 = vsel %vm1923_vm3, %v1957_v18, %v5326_v37 }
 0x15e   :  { %v1189_v7 = vpop.f32.mrb[36].mxu0 }
 0x15f   :  { %v4384_v8 = vpop.f32.mrb[37].mxu0  ;;  %v5318_v56 = vmul.f32 0.17677669, %v1189_v7 }
 0x160   :  { %v1240_v44 = vpop.f32.mrb[36].mxu1  ;;  %v1192_v49 = vpop.f32.mrb[38].mxu0 }
 0x161   :  { %v4390_v54 = vpop.f32.mrb[37].mxu1  ;;  %v4385_v55 = vpop.f32.mrb[39].mxu0  ;;  %v5321_v26 = vmul.f32 0.17677669, %v1240_v44  ;;  %v1959_v31 = vrot.slane %v5318_v56, 6 }
 0x162   :  { %v1243_v14 = vpop.f32.mrb[38].mxu1 }
 0x163   :  { %v4391_v17 = vpop.f32.mrb[39].mxu1  ;;  %v1961_v6 = vrot.slane %v5321_v26, 5  ;;  %v1960_v58 = vsel %vm1926_vm4, %v1959_v31, %v1958_v48 }
 0x165   :  { %v1962_v60 = vsel %vm1929_vm5, %v1961_v6, %v1960_v58 }
 0x166   :  { %v1291_v30 = vpop.f32.mrb[40].mxu0 }
 0x167   :  { %v5324_v34 = vmul.f32 0.17677669, %v1291_v30  ;;  %v4396_v36 = vpop.f32.mrb[41].mxu0 }
 0x168   :  { %v1342_v38 = vpop.f32.mrb[40].mxu1  ;;  %v1294_v40 = vpop.f32.mrb[42].mxu0 }
 0x169   :  { %v4402_v41 = vpop.f32.mrb[41].mxu1  ;;  %v4397_v47 = vpop.f32.mrb[43].mxu0  ;;  %v5331_v50 = vmul.f32 0.17677669, %v1342_v38  ;;  %v1963_v59 = vrot.slane %v5324_v34, 4 }
 0x16a   :  { %v1345_v57 = vpop.f32.mrb[42].mxu1 }
 0x16b   :  { %v4403_v53 = vpop.f32.mrb[43].mxu1  ;;  %v1965_v5 = vrot.slane %v5331_v50, 3  ;;  %v1964_v19 = vsel %vm1932_vm6, %v1963_v59, %v1962_v60 }
 0x16d   :  { %v1966_v25 = vsel %vm1935_vm7, %v1965_v5, %v1964_v19 }
 0x16e   :  { %v1393_v2 = vpop.f32.mrb[44].mxu0 }
 0x16f   :  { %v5338_v1 = vmul.f32 0.17677669, %v1393_v2  ;;  %v4408_v3 = vpop.f32.mrb[45].mxu0 }
 0x170   :  { %v1444_v13 = vpop.f32.mrb[44].mxu1  ;;  %v1396_v20 = vpop.f32.mrb[46].mxu0 }
 0x171   :  { %v1967_v4 = vrot.slane %v5338_v1, 2  ;;  %v5341_v21 = vmul.f32 0.17677669, %v1444_v13  ;;  %v4414_v24 = vpop.f32.mrb[45].mxu1  ;;  %v4409_v28 = vpop.f32.mrb[47].mxu0 }
 0x172   :  { %v1447_v10 = vpop.f32.mrb[46].mxu1 }
 0x173   :  { %v1969_v32 = vrot.slane %v5341_v21, 1  ;;  %v4415_v45 = vpop.f32.mrb[47].mxu1  ;;  %v1968_v11 = vsel %vm1938_vm8, %v1967_v4, %v1966_v25 }
 0x175   :  { %v1970_v43 = vsel %vm1941_vm9, %v1969_v32, %v1968_v11 }
 0x176   :  { %v1495_v46 = vpop.f32.mrb[48].mxu0  ;;  %v1996_v7 = vsel %vm1989_vm10, %v1970_v43, -inf }
 0x177   :  { %1997 = vmax.xlane.f32.xlu1 %v1996_v7  ;;  %v4420_v8 = vpop.f32.mrb[49].mxu0  ;;  %v5358_v2 = vmul.f32 0.17677669, %v1495_v46 }
 0x178   :  { %v1546_v44 = vpop.f32.mrb[48].mxu1  ;;  %v1498_v49 = vpop.f32.mrb[50].mxu0 }
 0x179   :  { %v4426_v54 = vpop.f32.mrb[49].mxu1  ;;  %v4421_v55 = vpop.f32.mrb[51].mxu0  ;;  %v5348_v41 = vmul.f32 0.17677669, %v1546_v44 }
 0x17a   :  { %v1549_v14 = vpop.f32.mrb[50].mxu1 }
 0x17b   :  { %v4427_v17 = vpop.f32.mrb[51].mxu1  ;;  %v1971_v57 = vrot.slane %v5348_v41, 7 }
 0x17d   :  { %v1972_v4 = vsel %vm1923_vm3, %v1971_v57, %v5358_v2 }
 0x17e   :  { %v1597_v18 = vpop.f32.mrb[52].mxu0 }
 0x17f   :  { %v4432_v30 = vpop.f32.mrb[53].mxu0  ;;  %v5350_v48 = vmul.f32 0.17677669, %v1597_v18 }
 0x180   :  { %v1648_v31 = vpop.f32.mrb[52].mxu1  ;;  %v1600_v36 = vpop.f32.mrb[54].mxu0 }
 0x181   :  { %v4438_v38 = vpop.f32.mrb[53].mxu1  ;;  %v4433_v40 = vpop.f32.mrb[55].mxu0  ;;  %v5353_v58 = vmul.f32 0.17677669, %v1648_v31  ;;  %v1973_v53 = vrot.slane %v5350_v48, 6 }
 0x182   :  { %v1651_v47 = vpop.f32.mrb[54].mxu1 }
 0x183   :  { %v4439_v6 = vpop.f32.mrb[55].mxu1  ;;  %v1975_v24 = vrot.slane %v5353_v58, 5  ;;  %v1974_v25 = vsel %vm1926_vm4, %v1973_v53, %v1972_v4 }
 0x185   :  { %v1976_v11 = vsel %vm1929_vm5, %v1975_v24, %v1974_v25 }
 0x186   :  { %v1699_v59 = vpop.f32.mrb[56].mxu0 }
 0x187   :  { %v5356_v60 = vmul.f32 0.17677669, %v1699_v59  ;;  %v4444_v5 = vpop.f32.mrb[57].mxu0 }
 0x188   :  { %v1750_v19 = vpop.f32.mrb[56].mxu1  ;;  %v1702_v3 = vpop.f32.mrb[58].mxu0 }
 0x189   :  { %v4450_v13 = vpop.f32.mrb[57].mxu1  ;;  %v4445_v20 = vpop.f32.mrb[59].mxu0  ;;  %v5363_v28 = vmul.f32 0.17677669, %v1750_v19  ;;  %v1977_v32 = vrot.slane %v5356_v60, 4 }
 0x18a   :  { %v1753_v10 = vpop.f32.mrb[58].mxu1 }
 0x18b   :  { %v4451_v45 = vpop.f32.mrb[59].mxu1  ;;  %v1979_v43 = vrot.slane %v5363_v28, 3  ;;  %v1978_v7 = vsel %vm1932_vm6, %v1977_v32, %v1976_v11 }
 0x18d   :  { %v1980_v31 = vsel %vm1935_vm7, %v1979_v43, %v1978_v7 }
 0x18e   :  { %v1801_v46 = vpop.f32.mrb[60].mxu0 }
 0x18f   :  { %v5370_v8 = vmul.f32 0.17677669, %v1801_v46  ;;  %v4456_v44 = vpop.f32.mrb[61].mxu0 }
 0x190   :  { %v1852_v49 = vpop.f32.mrb[60].mxu1  ;;  %v1804_v54 = vpop.f32.mrb[62].mxu0 }
 0x191   :  { %v1981_v55 = vrot.slane %v5370_v8, 2  ;;  %v5373_v14 = vmul.f32 0.17677669, %v1852_v49  ;;  %v4462_v17 = vpop.f32.mrb[61].mxu1  ;;  %v4457_v18 = vpop.f32.mrb[63].mxu0 }
 0x192   :  { %v1855_v30 = vpop.f32.mrb[62].mxu1 }
 0x193   :  { %v1983_v36 = vrot.slane %v5373_v14, 1  ;;  %v4463_v38 = vpop.f32.mrb[63].mxu1  ;;  %v1982_v40 = vsel %vm1938_vm8, %v1981_v55, %v1980_v31 }
 0x195   :  { %v1984_v47 = vsel %vm1941_vm9, %v1983_v36, %v1982_v40 }
 0x196   :  { %v1999_v6 = vsel %vm1989_vm10, %v1984_v47, -inf }
 0x197   :  { %2000 = vmax.xlane.f32.xlu1 %v1999_v6 }
 0x1c4   :  { %v1992_v57 = vpop.xlane.xlu0 %1991 }
 0x1c5   :  { %v2006_v59 = vrot.slane %v1992_v57, 1  ;;  %v2007_v53 = vrot.slane %v1992_v57, 2  ;;  %v2008_v5 = vrot.slane %v1992_v57, 3  ;;  %v2009_v19 = vrot.slane %v1992_v57, 4 }
 0x1c6   :  { %v2010_v3 = vrot.slane %v1992_v57, 5  ;;  %v2011_v13 = vrot.slane %v1992_v57, 6  ;;  %v2012_v20 = vrot.slane %v1992_v57, 7  ;;  %v2066_v4 = vsub.f32 %v5262_v35, %v1992_v57 }
 0x1c7   :  { %v2067_v24 = vsub.f32 %v5252_v22, %v2006_v59  ;;  %v2068_v10 = vsub.f32 %v5254_v23, %v2007_v53  ;;  %v2069_v25 = vsub.f32 %v5257_v29, %v2008_v5  ;;  %v2070_v32 = vsub.f32 %v5260_v33, %v2009_v19 }
 0x1c8   :  { %v2071_v45 = vsub.f32 %v5267_v42, %v2010_v3  ;;  %v2098_v11 = vmul.f32 1.442695, %v2066_v4  ;;  %v2072_v43 = vsub.f32 %v5274_v61, %v2011_v13  ;;  %v2073_v49 = vsub.f32 %v5277_v9, %v2012_v20 }
 0x1c9   :  { %v2100_v46 = vmul.f32 1.442695, %v2067_v24  ;;  %v2102_v7 = vmul.f32 1.442695, %v2068_v10  ;;  %v2104_v44 = vmul.f32 1.442695, %v2069_v25 }
 0x1ca   :  { %4668 = vpow2.f32 %v2098_v11  ;;  %v2106_v35 = vmul.f32 1.442695, %v2070_v32  ;;  %v2108_v22 = vmul.f32 1.442695, %v2071_v45  ;;  %v2110_v23 = vmul.f32 1.442695, %v2072_v43 }
 0x1cb   :  { %4670 = vpow2.f32 %v2100_v46  ;;  %v2112_v29 = vmul.f32 1.442695, %v2073_v49 }
 0x1cc   :  { %4672 = vpow2.f32 %v2102_v7 }
 0x1cd   :  { %4674 = vpow2.f32 %v2104_v44 }
 0x1ce   :  { %4676 = vpow2.f32 %v2106_v35 }
 0x1cf   :  { %4678 = vpow2.f32 %v2108_v22 }
 0x1d0   :  { %4680 = vpow2.f32 %v2110_v23 }
 0x1d1   :  { %4682 = vpow2.f32 %v2112_v29 }
 0x1d4   :  { %v5388_v33 = vpop.eup %4668 }
 0x1d5   :  { %v5390_v42 = vpop.eup %4670 }
 0x1d6   :  { %v5392_v61 = vpop.eup %4672  ;;  %v2194_v9 = vrot.slane %v5390_v42, 7 }
 0x1d7   :  { %v5395_v54 = vpop.eup %4674  ;;  %v2196_v55 = vrot.slane %v5392_v61, 6 }
 0x1d8   :  { %v5398_v17 = vpop.eup %4676  ;;  %v2195_v18 = vsel %vm1923_vm3, %v2194_v9, %v5388_v33  ;;  %v2198_v30 = vrot.slane %v5395_v54, 5 }
 0x1d9   :  { %v5403_v31 = vpop.eup %4678  ;;  %v2197_v36 = vsel %vm1926_vm4, %v2196_v55, %v2195_v18  ;;  %v2200_v38 = vrot.slane %v5398_v17, 4 }
 0x1da   :  { %v5407_v40 = vpop.eup %4680  ;;  %v2199_v47 = vsel %vm1929_vm5, %v2198_v30, %v2197_v36  ;;  %v2202_v6 = vrot.slane %v5403_v31, 3 }
 0x1db   :  { %v5411_v57 = vpop.eup %4682  ;;  %v2201_v59 = vsel %vm1932_vm6, %v2200_v38, %v2199_v47  ;;  %v2204_v53 = vrot.slane %v5407_v40, 2 }
 0x1dc   :  { %v2203_v5 = vsel %vm1935_vm7, %v2202_v6, %v2201_v59  ;;  %v2206_v19 = vrot.slane %v5411_v57, 1 }
 0x1dd   :  { %v2205_v3 = vsel %vm1938_vm8, %v2204_v53, %v2203_v5 }
 0x1de   :  { %v2207_v13 = vsel %vm1941_vm9, %v2206_v19, %v2205_v3 }
 0x1df   :  { %v2254_v20 = vsel %vm1989_vm10, %v2207_v13, 0.0 }
 0x1e0   :  { %2255 = vadd.xlane.f32.xlu0 %v2254_v20 }
 0x1e4   :  { %v1995_v4 = vpop.xlane.xlu0 %1994 }
 0x1e5   :  { %v2013_v24 = vrot.slane %v1995_v4, 1  ;;  %v2014_v10 = vrot.slane %v1995_v4, 2  ;;  %v2015_v25 = vrot.slane %v1995_v4, 3  ;;  %v2016_v32 = vrot.slane %v1995_v4, 4 }
 0x1e6   :  { %v2017_v45 = vrot.slane %v1995_v4, 5  ;;  %v2018_v11 = vrot.slane %v1995_v4, 6  ;;  %v2019_v43 = vrot.slane %v1995_v4, 7  ;;  %v2074_v46 = vsub.f32 %v5294_v27, %v1995_v4 }
 0x1e7   :  { %v2075_v7 = vsub.f32 %v5284_v12, %v2013_v24  ;;  %v2076_v44 = vsub.f32 %v5286_v16, %v2014_v10  ;;  %v2077_v49 = vsub.f32 %v5289_v62, %v2015_v25  ;;  %v2078_v35 = vsub.f32 %v5292_v51, %v2016_v32 }
 0x1e8   :  { %v2079_v22 = vsub.f32 %v5299_v39, %v2017_v45  ;;  %v2114_v23 = vmul.f32 1.442695, %v2074_v46  ;;  %v2080_v29 = vsub.f32 %v5306_v52, %v2018_v11  ;;  %v2081_v30 = vsub.f32 %v5309_v63, %v2019_v43 }
 0x1e9   :  { %v2116_v9 = vmul.f32 1.442695, %v2075_v7  ;;  %v2118_v55 = vmul.f32 1.442695, %v2076_v44  ;;  %v2120_v18 = vmul.f32 1.442695, %v2077_v49 }
 0x1ea   :  { %4684 = vpow2.f32 %v2114_v23  ;;  %v2122_v27 = vmul.f32 1.442695, %v2078_v35  ;;  %v2124_v12 = vmul.f32 1.442695, %v2079_v22  ;;  %v2126_v16 = vmul.f32 1.442695, %v2080_v29 }
 0x1eb   :  { %4686 = vpow2.f32 %v2116_v9  ;;  %v2128_v62 = vmul.f32 1.442695, %v2081_v30 }
 0x1ec   :  { %4688 = vpow2.f32 %v2118_v55 }
 0x1ed   :  { %4690 = vpow2.f32 %v2120_v18 }
 0x1ee   :  { %4692 = vpow2.f32 %v2122_v27 }
 0x1ef   :  { %4694 = vpow2.f32 %v2124_v12 }
 0x1f0   :  { %4696 = vpow2.f32 %v2126_v16 }
 0x1f1   :  { %4698 = vpow2.f32 %v2128_v62 }
 0x1f4   :  { %v5428_v51 = vpop.eup %4684 }
 0x1f5   :  { %v5430_v39 = vpop.eup %4686 }
 0x1f6   :  { %v5432_v52 = vpop.eup %4688  ;;  %v2208_v63 = vrot.slane %v5430_v39, 7 }
 0x1f7   :  { %v5435_v36 = vpop.eup %4690  ;;  %v2210_v38 = vrot.slane %v5432_v52, 6 }
 0x1f8   :  { %v5438_v47 = vpop.eup %4692  ;;  %v2209_v6 = vsel %vm1923_vm3, %v2208_v63, %v5428_v51  ;;  %v2212_v59 = vrot.slane %v5435_v36, 5 }
 0x1f9   :  { %v5443_v53 = vpop.eup %4694  ;;  %v2211_v5 = vsel %vm1926_vm4, %v2210_v38, %v2209_v6  ;;  %v2214_v19 = vrot.slane %v5438_v47, 4 }
 0x1fa   :  { %v5447_v3 = vpop.eup %4696  ;;  %v2213_v13 = vsel %vm1929_vm5, %v2212_v59, %v2211_v5  ;;  %v2216_v20 = vrot.slane %v5443_v53, 3 }
 0x1fb   :  { %v5451_v4 = vpop.eup %4698  ;;  %v2215_v24 = vsel %vm1932_vm6, %v2214_v19, %v2213_v13  ;;  %v2218_v10 = vrot.slane %v5447_v3, 2 }
 0x1fc   :  { %v2217_v25 = vsel %vm1935_vm7, %v2216_v20, %v2215_v24  ;;  %v2220_v32 = vrot.slane %v5451_v4, 1 }
 0x1fd   :  { %v2219_v45 = vsel %vm1938_vm8, %v2218_v10, %v2217_v25 }
 0x1fe   :  { %v2221_v11 = vsel %vm1941_vm9, %v2220_v32, %v2219_v45 }
 0x1ff   :  { %v2257_v43 = vsel %vm1989_vm10, %v2221_v11, 0.0 }
 0x200   :  { %2258 = vadd.xlane.f32.xlu1 %v2257_v43 }
 0x204   :  { %v1998_v46 = vpop.xlane.xlu1 %1997 }
 0x205   :  { %v2020_v7 = vrot.slane %v1998_v46, 1  ;;  %v2021_v44 = vrot.slane %v1998_v46, 2  ;;  %v2022_v49 = vrot.slane %v1998_v46, 3  ;;  %v2023_v35 = vrot.slane %v1998_v46, 4 }
 0x206   :  { %v2024_v22 = vrot.slane %v1998_v46, 5  ;;  %v2025_v23 = vrot.slane %v1998_v46, 6  ;;  %v2026_v29 = vrot.slane %v1998_v46, 7  ;;  %v2082_v9 = vsub.f32 %v5326_v37, %v1998_v46 }
 0x207   :  { %v2083_v55 = vsub.f32 %v5316_v15, %v2020_v7  ;;  %v2084_v18 = vsub.f32 %v5318_v56, %v2021_v44  ;;  %v2085_v30 = vsub.f32 %v5321_v26, %v2022_v49  ;;  %v2086_v27 = vsub.f32 %v5324_v34, %v2023_v35 }
 0x208   :  { %v2087_v12 = vsub.f32 %v5331_v50, %v2024_v22  ;;  %v2130_v16 = vmul.f32 1.442695, %v2082_v9  ;;  %v2088_v62 = vsub.f32 %v5338_v1, %v2025_v23  ;;  %v2089_v59 = vsub.f32 %v5341_v21, %v2026_v29 }
 0x209   :  { %v2132_v63 = vmul.f32 1.442695, %v2083_v55  ;;  %v2134_v38 = vmul.f32 1.442695, %v2084_v18  ;;  %v2136_v6 = vmul.f32 1.442695, %v2085_v30 }
 0x20a   :  { %4700 = vpow2.f32 %v2130_v16  ;;  %v2138_v37 = vmul.f32 1.442695, %v2086_v27  ;;  %v2140_v15 = vmul.f32 1.442695, %v2087_v12  ;;  %v2142_v56 = vmul.f32 1.442695, %v2088_v62 }
 0x20b   :  { %4702 = vpow2.f32 %v2132_v63  ;;  %v2144_v26 = vmul.f32 1.442695, %v2089_v59 }
 0x20c   :  { %4704 = vpow2.f32 %v2134_v38 }
 0x20d   :  { %4706 = vpow2.f32 %v2136_v6 }
 0x20e   :  { %4708 = vpow2.f32 %v2138_v37 }
 0x20f   :  { %4710 = vpow2.f32 %v2140_v15 }
 0x210   :  { %4712 = vpow2.f32 %v2142_v56 }
 0x211   :  { %4714 = vpow2.f32 %v2144_v26 }
 0x214   :  { %v5468_v34 = vpop.eup %4700 }
 0x215   :  { %v5470_v50 = vpop.eup %4702 }
 0x216   :  { %v5472_v1 = vpop.eup %4704  ;;  %v2222_v21 = vrot.slane %v5470_v50, 7 }
 0x217   :  { %v5475_v5 = vpop.eup %4706  ;;  %v2224_v19 = vrot.slane %v5472_v1, 6 }
 0x218   :  { %v5478_v13 = vpop.eup %4708  ;;  %v2223_v20 = vsel %vm1923_vm3, %v2222_v21, %v5468_v34  ;;  %v2226_v24 = vrot.slane %v5475_v5, 5 }
 0x219   :  { %v5483_v10 = vpop.eup %4710  ;;  %v2225_v25 = vsel %vm1926_vm4, %v2224_v19, %v2223_v20  ;;  %v2228_v32 = vrot.slane %v5478_v13, 4 }
 0x21a   :  { %v5487_v45 = vpop.eup %4712  ;;  %v2227_v11 = vsel %vm1929_vm5, %v2226_v24, %v2225_v25  ;;  %v2230_v43 = vrot.slane %v5483_v10, 3 }
 0x21b   :  { %v5491_v46 = vpop.eup %4714  ;;  %v2229_v7 = vsel %vm1932_vm6, %v2228_v32, %v2227_v11  ;;  %v2232_v44 = vrot.slane %v5487_v45, 2 }
 0x21c   :  { %v2231_v49 = vsel %vm1935_vm7, %v2230_v43, %v2229_v7  ;;  %v2234_v35 = vrot.slane %v5491_v46, 1 }
 0x21d   :  { %v2233_v22 = vsel %vm1938_vm8, %v2232_v44, %v2231_v49 }
 0x21e   :  { %v2235_v23 = vsel %vm1941_vm9, %v2234_v35, %v2233_v22 }
 0x21f   :  { %v2260_v29 = vsel %vm1989_vm10, %v2235_v23, 0.0 }
 0x220   :  { %2261 = vadd.xlane.f32.xlu0 %v2260_v29 }
 0x224   :  { %v2001_v9 = vpop.xlane.xlu1 %2000 }
 0x225   :  { %v2027_v55 = vrot.slane %v2001_v9, 1  ;;  %v2028_v18 = vrot.slane %v2001_v9, 2  ;;  %v2029_v30 = vrot.slane %v2001_v9, 3  ;;  %v2030_v27 = vrot.slane %v2001_v9, 4 }
 0x226   :  { %v2031_v12 = vrot.slane %v2001_v9, 5  ;;  %v2032_v16 = vrot.slane %v2001_v9, 6  ;;  %v2033_v62 = vrot.slane %v2001_v9, 7  ;;  %v2090_v63 = vsub.f32 %v5358_v2, %v2001_v9 }
 0x227   :  { %v2091_v38 = vsub.f32 %v5348_v41, %v2027_v55  ;;  %v2092_v6 = vsub.f32 %v5350_v48, %v2028_v18  ;;  %v2093_v59 = vsub.f32 %v5353_v58, %v2029_v30  ;;  %v2094_v37 = vsub.f32 %v5356_v60, %v2030_v27 }
 0x228   :  { %v2095_v15 = vsub.f32 %v5363_v28, %v2031_v12  ;;  %v2146_v56 = vmul.f32 1.442695, %v2090_v63  ;;  %v2096_v26 = vsub.f32 %v5370_v8, %v2032_v16  ;;  %v2097_v24 = vsub.f32 %v5373_v14, %v2033_v62 }
 0x229   :  { %v2148_v21 = vmul.f32 1.442695, %v2091_v38  ;;  %v2150_v19 = vmul.f32 1.442695, %v2092_v6  ;;  %v2152_v20 = vmul.f32 1.442695, %v2093_v59 }
 0x22a   :  { %4716 = vpow2.f32 %v2146_v56  ;;  %v2154_v2 = vmul.f32 1.442695, %v2094_v37  ;;  %v2156_v41 = vmul.f32 1.442695, %v2095_v15  ;;  %v2158_v48 = vmul.f32 1.442695, %v2096_v26 }
 0x22b   :  { %4718 = vpow2.f32 %v2148_v21  ;;  %v2160_v58 = vmul.f32 1.442695, %v2097_v24  ;;  %v4740_v56 = vld [vmem:[#allocation5 + $0x8] sm:$0xf] }
 0x22c   :  { %4720 = vpow2.f32 %v2150_v19  ;;  %v2492_v26 = vsel %vm2401_vm2, %v4740_v56, 0 }
 0x22d   :  { %4722 = vpow2.f32 %v2152_v20  ;;  %v4741_v20 = vld [vmem:[#allocation5 + $0xc] sm:$0xf] }
 0x22e   :  { %4724 = vpow2.f32 %v2154_v2  ;;  %v2537_v24 = vsel %vm2401_vm2, %v4741_v20, 0 }
 0x22f   :  { %4726 = vpow2.f32 %v2156_v41 }
 0x230   :  { %4728 = vpow2.f32 %v2158_v48  ;;  %v4742_v48 = vld [vmem:[#allocation5 + $0x10] sm:$0xf] }
 0x231   :  { %4730 = vpow2.f32 %v2160_v58  ;;  %v2582_v58 = vsel %vm2401_vm2, %v4742_v48, 0  ;;  %v4750_v48 = vld [vmem:[#allocation5 + $0x30] sm:$0xf] }
 0x234   :  { %v5508_v60 = vpop.eup %4716 }
 0x235   :  { %v5510_v28 = vpop.eup %4718 }
 0x236   :  { %v5512_v8 = vpop.eup %4720  ;;  %v2236_v14 = vrot.slane %v5510_v28, 7 }
 0x237   :  { %v5515_v25 = vpop.eup %4722  ;;  %v2238_v32 = vrot.slane %v5512_v8, 6 }
 0x238   :  { %v5518_v11 = vpop.eup %4724  ;;  %v2237_v43 = vsel %vm1923_vm3, %v2236_v14, %v5508_v60  ;;  %v2240_v7 = vrot.slane %v5515_v25, 5 }
 0x239   :  { %v5523_v44 = vpop.eup %4726  ;;  %v2239_v49 = vsel %vm1926_vm4, %v2238_v32, %v2237_v43  ;;  %v2242_v35 = vrot.slane %v5518_v11, 4  ;;  %v4743_v43 = vld [vmem:[#allocation5 + $0x14] sm:$0xf] }
 0x23a   :  { %v5527_v22 = vpop.eup %4728  ;;  %v2241_v23 = vsel %vm1929_vm5, %v2240_v7, %v2239_v49  ;;  %v2244_v29 = vrot.slane %v5523_v44, 3 }
 0x23b   :  { %v5531_v9 = vpop.eup %4730  ;;  %v2243_v55 = vsel %vm1932_vm6, %v2242_v35, %v2241_v23  ;;  %v2246_v18 = vrot.slane %v5527_v22, 2  ;;  %v4744_v23 = vld [vmem:[#allocation5 + $0x18] sm:$0xf] }
 0x23c   :  { %v2245_v30 = vsel %vm1935_vm7, %v2244_v29, %v2243_v55  ;;  %v2248_v27 = vrot.slane %v5531_v9, 1  ;;  %v2672_v29 = vsel %vm2401_vm2, %v4744_v23, 0 }
 0x23d   :  { %v2247_v12 = vsel %vm1938_vm8, %v2246_v18, %v2245_v30 }
 0x23e   :  { %v2249_v16 = vsel %vm1941_vm9, %v2248_v27, %v2247_v12 }
 0x23f   :  { %v2263_v62 = vsel %vm1989_vm10, %v2249_v16, 0.0 }
 0x240   :  { %2264 = vadd.xlane.f32.xlu1 %v2263_v62 }
 0x26d   :  { %v2256_v63 = vpop.xlane.xlu0 %2255 }
 0x26e   :  { %4732 = vrcp.f32 %v2256_v63  ;;  %v4746_v63 = vld [vmem:[#allocation5 + $0x20] sm:$0xf] }
 0x278   :  { %v4733_v38 = vpop.eup %4732 }
 0x279   :  { %v2334_v6 = vmul.f32 %v4733_v38, %v5388_v33  ;;  %v2274_v59 = vrot.slane %v4733_v38, 1  ;;  %v2275_v21 = vrot.slane %v4733_v38, 2  ;;  %v2276_v2 = vrot.slane %v4733_v38, 3 }
 0x27a   :  { %v2277_v14 = vrot.slane %v4733_v38, 4  ;;  %v2278_v7 = vrot.slane %v4733_v38, 5  ;;  %v2279_v55 = vrot.slane %v4733_v38, 6  ;;  %v2280_v12 = vrot.slane %v4733_v38, 7 }
 0x27b   :  { %v2366_v37 = vpack.c.bf16 %v2334_v6, %v2334_v6  ;;  %v2335_v15 = vmul.f32 %v5390_v42, %v2274_v59  ;;  %v2336_v33 = vmul.f32 %v5392_v61, %v2275_v21  ;;  %v2337_v42 = vmul.f32 %v5395_v54, %v2276_v2  ;;  %v4747_v59 = vld [vmem:[#allocation5 + $0x24] sm:$0xf]  ;;  %v4748_v21 = vld [vmem:[#allocation5 + $0x28] sm:$0xf]  ;;  %v4749_v2 = vld [vmem:[#allocation5 + $0x2c] sm:$0xf] }
 0x27c   :  { %v2627_v61 = vsel %vm2401_vm2, %v4743_v43, 0  ;;  %v2338_v54 = vmul.f32 %v5398_v17, %v2277_v14  ;;  %v2339_v49 = vmul.f32 %v5403_v31, %v2278_v7  ;;  %v4745_v17 = vld [vmem:[#allocation5 + $0x1c] sm:$0xf]  ;;  %v2340_v31 = vmul.f32 %v5407_v40, %v2279_v55  ;;  %v4751_v43 = vld [vmem:[#allocation5 + $0x34] sm:$0xf] }
 0x27d   :  { %4467 = vmatmul.mubr.msk.bf16.vlgmr.msra.gmra.mrb[64].mxu0 %vm1989_vm10, %v2366_v37  ;;  %v2367_v19 = vpack.c.bf16 %v2335_v15, %v2335_v15  ;;  %v2368_v41 = vpack.c.bf16 %v2336_v33, %v2336_v33  ;;  %v2369_v32 = vpack.c.bf16 %v2337_v42, %v2337_v42  ;;  %v2717_v27 = vsel %vm2401_vm2, %v4745_v17, 0 }
 0x27e   :  { %4477 = vmatpush3.bf16.msra.mxu0 %v2492_v26  ;;  %4478 = vmatprep.mubr.msk.bf16.mxu0 %vm4870_vm0, %v4869_v0  ;;  %v2370_v35 = vpack.c.bf16 %v2338_v54, %v2338_v54  ;;  %v2371_v30 = vpack.c.bf16 %v2339_v49, %v2339_v49  ;;  %v2341_v16 = vmul.f32 %v5411_v57, %v2280_v12  ;;  %v2762_v38 = vsel %vm2401_vm2, %v4746_v63, 0  ;;  %v4752_v49 = vld [vmem:[#allocation5 + $0x38] sm:$0xf]  ;;  %v4754_v12 = vld [vmem:[#allocation5 + $0x40] sm:$0xf] }
 0x27f   :  { %4473 = vmatmul.mubr.msk.bf16.vlgmr.msra.gmra.mrb[64].mxu1 %vm1989_vm10, %v2367_v19  ;;  %4488 = vmatprep.subr.bf16.mxu0 %v4869_v0  ;;  %v2372_v62 = vpack.c.bf16 %v2340_v31, %v2340_v31  ;;  %v2807_v40 = vsel %vm2401_vm2, %v4747_v59, 0  ;;  %v2852_v19 = vsel %vm2401_vm2, %v4748_v21, 0  ;;  %v2897_v33 = vsel %vm2401_vm2, %v4749_v2, 0 }
 0x280   :  { %4483 = vmatpush3.bf16.msra.mxu1 %v2537_v24  ;;  %4484 = vmatprep.mubr.msk.bf16.mxu1 %vm4870_vm0, %v4869_v0  ;;  %v2373_v6 = vpack.c.bf16 %v2341_v16, %v2341_v16  ;;  %v3122_v31 = vsel %vm2401_vm2, %v4754_v12, 0  ;;  %v4765_v12 = vld [vmem:[#allocation5 + $0x6c] sm:$0xf] }
 0x281   :  { %4494 = vmatprep.subr.bf16.mxu1 %v4869_v0 }
 0x285   :  { %4479 = vmatmul.mubr.msk.bf16.vlgmr.msra.gmra.mrb[68].mxu0 %vm1989_vm10, %v2368_v41 }
 0x286   :  { %4489 = vmatpush3.bf16.msra.mxu0 %v2582_v58  ;;  %4490 = vmatprep.mubr.msk.bf16.mxu0 %vm4870_vm0, %v4869_v0  ;;  %v2942_v58 = vsel %vm2401_vm2, %v4750_v48, 0  ;;  %v4760_v48 = vld [vmem:[#allocation5 + $0x58] sm:$0xf] }
 0x287   :  { %4485 = vmatmul.mubr.msk.bf16.vlgmr.msra.gmra.mrb[68].mxu1 %vm1989_vm10, %v2369_v32  ;;  %4500 = vmatprep.subr.bf16.mxu0 %v4869_v0 }
 0x288   :  { %4495 = vmatpush3.bf16.msra.mxu1 %v2627_v61  ;;  %4496 = vmatprep.mubr.msk.bf16.mxu1 %vm4870_vm0, %v4869_v0 }
 0x289   :  { %4506 = vmatprep.subr.bf16.mxu1 %v4869_v0 }
 0x28d   :  { %4491 = vmatmul.mubr.msk.bf16.vlgmr.msra.gmra.mrb[72].mxu0 %vm1989_vm10, %v2370_v35  ;;  %v2259_v18 = vpop.xlane.xlu1 %2258  ;;  %v3032_v35 = vsel %vm2401_vm2, %v4752_v49, 0 }
 0x28e   :  { %4734 = vrcp.f32 %v2259_v18  ;;  %4501 = vmatpush3.bf16.msra.mxu0 %v2672_v29  ;;  %4502 = vmatprep.mubr.msk.bf16.mxu0 %vm4870_vm0, %v4869_v0 }
 0x28f   :  { %4497 = vmatmul.mubr.msk.bf16.vlgmr.msra.gmra.mrb[72].mxu1 %vm1989_vm10, %v2371_v30  ;;  %4512 = vmatprep.subr.bf16.mxu0 %v4869_v0 }
 0x290   :  { %4507 = vmatpush3.bf16.msra.mxu1 %v2717_v27  ;;  %4508 = vmatprep.mubr.msk.bf16.mxu1 %vm4870_vm0, %v4869_v0 }
 0x291   :  { %4518 = vmatprep.subr.bf16.mxu1 %v4869_v0 }
 0x295   :  { %4503 = vmatmul.mubr.msk.bf16.vlgmr.msra.gmra.mrb[76].mxu0 %vm1989_vm10, %v2372_v62  ;;  %v4755_v62 = vld [vmem:[#allocation5 + $0x44] sm:$0xf] }
 0x296   :  { %4513 = vmatpush3.bf16.msra.mxu0 %v2762_v38  ;;  %4514 = vmatprep.mubr.msk.bf16.mxu0 %vm4870_vm0, %v4869_v0 }
 0x297   :  { %4509 = vmatmul.mubr.msk.bf16.vlgmr.msra.gmra.mrb[76].mxu1 %vm1989_vm10, %v2373_v6  ;;  %4524 = vmatprep.subr.bf16.mxu0 %v4869_v0 }
 0x298   :  { %v4735_v57 = vpop.eup %4734  ;;  %4519 = vmatpush3.bf16.msra.mxu1 %v2807_v40  ;;  %4520 = vmatprep.mubr.msk.bf16.mxu1 %vm4870_vm0, %v4869_v0  ;;  %v4756_v40 = vld [vmem:[#allocation5 + $0x48] sm:$0xf] }
 0x299   :  { %v2342_v37 = vmul.f32 %v4735_v57, %v5428_v51  ;;  %v2281_v15 = vrot.slane %v4735_v57, 1  ;;  %4530 = vmatprep.subr.bf16.mxu1 %v4869_v0  ;;  %v2282_v20 = vrot.slane %v4735_v57, 2  ;;  %v2283_v42 = vrot.slane %v4735_v57, 3 }
 0x29a   :  { %v2284_v14 = vrot.slane %v4735_v57, 4  ;;  %v2285_v61 = vrot.slane %v4735_v57, 5  ;;  %v2286_v23 = vrot.slane %v4735_v57, 6  ;;  %v2287_v30 = vrot.slane %v4735_v57, 7 }
 0x29b   :  { %v2374_v56 = vpack.c.bf16 %v2342_v37, %v2342_v37  ;;  %v2343_v26 = vmul.f32 %v5430_v39, %v2281_v15  ;;  %v2344_v51 = vmul.f32 %v5432_v52, %v2282_v20  ;;  %v2345_v39 = vmul.f32 %v5435_v36, %v2283_v42  ;;  %v4758_v20 = vld [vmem:[#allocation5 + $0x50] sm:$0xf]  ;;  %v4759_v42 = vld [vmem:[#allocation5 + $0x54] sm:$0xf] }
 0x29c   :  { %v2987_v52 = vsel %vm2401_vm2, %v4751_v43, 0  ;;  %v2346_v36 = vmul.f32 %v5438_v47, %v2284_v14  ;;  %v2347_v7 = vmul.f32 %v5443_v53, %v2285_v61  ;;  %v4753_v47 = vld [vmem:[#allocation5 + $0x3c] sm:$0xf]  ;;  %v2348_v53 = vmul.f32 %v5447_v3, %v2286_v23  ;;  %v4763_v23 = vld [vmem:[#allocation5 + $0x64] sm:$0xf] }
 0x29d   :  { %4515 = vmatmul.mubr.msk.bf16.vlgmr.msra.gmra.mrb[80].mxu0 %vm1989_vm10, %v2374_v56  ;;  %v2375_v24 = vpack.c.bf16 %v2343_v26, %v2343_v26  ;;  %v2376_v41 = vpack.c.bf16 %v2344_v51, %v2344_v51  ;;  %v2377_v32 = vpack.c.bf16 %v2345_v39, %v2345_v39  ;;  %v3077_v18 = vsel %vm2401_vm2, %v4753_v47, 0  ;;  %v4757_v56 = vld [vmem:[#allocation5 + $0x4c] sm:$0xf] }
 0x29e   :  { %4525 = vmatpush3.bf16.msra.mxu0 %v2852_v19  ;;  %4526 = vmatprep.mubr.msk.bf16.mxu0 %vm4870_vm0, %v4869_v0  ;;  %v2378_v54 = vpack.c.bf16 %v2346_v36, %v2346_v36  ;;  %v2379_v55 = vpack.c.bf16 %v2347_v7, %v2347_v7  ;;  %v2349_v17 = vmul.f32 %v5451_v4, %v2287_v30  ;;  %v3167_v3 = vsel %vm2401_vm2, %v4755_v62, 0  ;;  %v4764_v30 = vld [vmem:[#allocation5 + $0x68] sm:$0xf] }
 0x29f   :  { %4521 = vmatmul.mubr.msk.bf16.vlgmr.msra.gmra.mrb[80].mxu1 %vm1989_vm10, %v2375_v24  ;;  %4536 = vmatprep.subr.bf16.mxu0 %v4869_v0  ;;  %v2380_v27 = vpack.c.bf16 %v2348_v53, %v2348_v53  ;;  %v3212_v57 = vsel %vm2401_vm2, %v4756_v40, 0  ;;  %v3257_v26 = vsel %vm2401_vm2, %v4757_v56, 0  ;;  %v3302_v24 = vsel %vm2401_vm2, %v4758_v20, 0 }
 0x2a0   :  { %4531 = vmatpush3.bf16.msra.mxu1 %v2897_v33  ;;  %4532 = vmatprep.mubr.msk.bf16.mxu1 %vm4870_vm0, %v4869_v0  ;;  %v2381_v16 = vpack.c.bf16 %v2349_v17, %v2349_v17  ;;  %v3572_v53 = vsel %vm2401_vm2, %v4764_v30, 0 }
 0x2a1   :  { %4542 = vmatprep.subr.bf16.mxu1 %v4869_v0 }
 0x2a5   :  { %4527 = vmatmul.mubr.msk.bf16.vlgmr.msra.gmra.mrb[84].mxu0 %vm1989_vm10, %v2376_v41 }
 0x2a6   :  { %4537 = vmatpush3.bf16.msra.mxu0 %v2942_v58  ;;  %4538 = vmatprep.mubr.msk.bf16.mxu0 %vm4870_vm0, %v4869_v0  ;;  %v3392_v58 = vsel %vm2401_vm2, %v4760_v48, 0 }
 0x2a7   :  { %4533 = vmatmul.mubr.msk.bf16.vlgmr.msra.gmra.mrb[84].mxu1 %vm1989_vm10, %v2377_v32  ;;  %4548 = vmatprep.subr.bf16.mxu0 %v4869_v0 }
 0x2a8   :  { %4543 = vmatpush3.bf16.msra.mxu1 %v2987_v52  ;;  %4544 = vmatprep.mubr.msk.bf16.mxu1 %vm4870_vm0, %v4869_v0 }
 0x2a9   :  { %4554 = vmatprep.subr.bf16.mxu1 %v4869_v0 }
 0x2ad   :  { %v2262_v29 = vpop.xlane.xlu0 %2261  ;;  %4539 = vmatmul.mubr.msk.bf16.vlgmr.msra.gmra.mrb[88].mxu0 %vm1989_vm10, %v2378_v54  ;;  %v4762_v54 = vld [vmem:[#allocation5 + $0x60] sm:$0xf] }
 0x2ae   :  { %4736 = vrcp.f32 %v2262_v29  ;;  %4549 = vmatpush3.bf16.msra.mxu0 %v3032_v35  ;;  %4550 = vmatprep.mubr.msk.bf16.mxu0 %vm4870_vm0, %v4869_v0  ;;  %v3482_v49 = vsel %vm2401_vm2, %v4762_v54, 0 }
 0x2af   :  { %4545 = vmatmul.mubr.msk.bf16.vlgmr.msra.gmra.mrb[88].mxu1 %vm1989_vm10, %v2379_v55  ;;  %4560 = vmatprep.subr.bf16.mxu0 %v4869_v0 }
 0x2b0   :  { %4555 = vmatpush3.bf16.msra.mxu1 %v3077_v18  ;;  %4556 = vmatprep.mubr.msk.bf16.mxu1 %vm4870_vm0, %v4869_v0 }
 0x2b1   :  { %4566 = vmatprep.subr.bf16.mxu1 %v4869_v0 }
 0x2b5   :  { %4551 = vmatmul.mubr.msk.bf16.vlgmr.msra.gmra.mrb[92].mxu0 %vm1989_vm10, %v2380_v27 }
 0x2b6   :  { %4561 = vmatpush3.bf16.msra.mxu0 %v3122_v31  ;;  %4562 = vmatprep.mubr.msk.bf16.mxu0 %vm4870_vm0, %v4869_v0  ;;  %v3617_v31 = vsel %vm2401_vm2, %v4765_v12, 0 }
 0x2b7   :  { %4557 = vmatmul.mubr.msk.bf16.vlgmr.msra.gmra.mrb[92].mxu1 %vm1989_vm10, %v2381_v16  ;;  %4572 = vmatprep.subr.bf16.mxu0 %v4869_v0 }
 0x2b8   :  { %v4737_v4 = vpop.eup %4736  ;;  %4567 = vmatpush3.bf16.msra.mxu1 %v3167_v3  ;;  %4568 = vmatprep.mubr.msk.bf16.mxu1 %vm4870_vm0, %v4869_v0  ;;  %v4766_v3 = vld [vmem:[#allocation5 + $0x70] sm:$0xf] }
 0x2b9   :  { %v2350_v63 = vmul.f32 %v4737_v4, %v5468_v34  ;;  %v2288_v38 = vrot.slane %v4737_v4, 1  ;;  %4578 = vmatprep.subr.bf16.mxu1 %v4869_v0  ;;  %v2289_v37 = vrot.slane %v4737_v4, 2  ;;  %v2290_v21 = vrot.slane %v4737_v4, 3 }
 0x2ba   :  { %v2291_v2 = vrot.slane %v4737_v4, 4  ;;  %v2292_v51 = vrot.slane %v4737_v4, 5  ;;  %v2293_v14 = vrot.slane %v4737_v4, 6  ;;  %v2294_v61 = vrot.slane %v4737_v4, 7 }
 0x2bb   :  { %v2382_v6 = vpack.c.bf16 %v2350_v63, %v2350_v63  ;;  %v2351_v59 = vmul.f32 %v5470_v50, %v2288_v38  ;;  %v2352_v34 = vmul.f32 %v5472_v1, %v2289_v37  ;;  %v2353_v50 = vmul.f32 %v5475_v5, %v2290_v21  ;;  %v4768_v37 = vld [vmem:[#allocation5 + $0x78] sm:$0xf]  ;;  %v4769_v21 = vld [vmem:[#allocation5 + $0x7c] sm:$0xf] }
 0x2bc   :  { %v3347_v1 = vsel %vm2401_vm2, %v4759_v42, 0  ;;  %v2354_v5 = vmul.f32 %v5478_v13, %v2291_v2  ;;  %v2355_v39 = vmul.f32 %v5483_v10, %v2292_v51  ;;  %v4761_v13 = vld [vmem:[#allocation5 + $0x5c] sm:$0xf]  ;;  %v2356_v10 = vmul.f32 %v5487_v45, %v2293_v14 }
 0x2bd   :  { %4563 = vmatmul.mubr.msk.bf16.vlgmr.msra.gmra.mrb[96].mxu0 %vm1989_vm10, %v2382_v6  ;;  %v2383_v15 = vpack.c.bf16 %v2351_v59, %v2351_v59  ;;  %v2384_v19 = vpack.c.bf16 %v2352_v34, %v2352_v34  ;;  %v2385_v33 = vpack.c.bf16 %v2353_v50, %v2353_v50  ;;  %v3437_v52 = vsel %vm2401_vm2, %v4761_v13, 0  ;;  %v4767_v6 = vld [vmem:[#allocation5 + $0x74] sm:$0xf] }
 0x2be   :  { %4573 = vmatpush3.bf16.msra.mxu0 %v3212_v57  ;;  %4574 = vmatprep.mubr.msk.bf16.mxu0 %vm4870_vm0, %v4869_v0  ;;  %v2386_v41 = vpack.c.bf16 %v2354_v5, %v2354_v5  ;;  %v2387_v43 = vpack.c.bf16 %v2355_v39, %v2355_v39  ;;  %v2357_v36 = vmul.f32 %v5491_v46, %v2294_v61  ;;  %v3527_v45 = vsel %vm2401_vm2, %v4763_v23, 0 }
 0x2bf   :  { %4569 = vmatmul.mubr.msk.bf16.vlgmr.msra.gmra.mrb[96].mxu1 %vm1989_vm10, %v2383_v15  ;;  %4584 = vmatprep.subr.bf16.mxu0 %v4869_v0  ;;  %v2388_v7 = vpack.c.bf16 %v2356_v10, %v2356_v10  ;;  %v3662_v4 = vsel %vm2401_vm2, %v4766_v3, 0  ;;  %v3752_v15 = vsel %vm2401_vm2, %v4768_v37, 0 }
 0x2c0   :  { %4579 = vmatpush3.bf16.msra.mxu1 %v3257_v26  ;;  %4580 = vmatprep.mubr.msk.bf16.mxu1 %vm4870_vm0, %v4869_v0  ;;  %v2389_v35 = vpack.c.bf16 %v2357_v36, %v2357_v36 }
 0x2c1   :  { %4590 = vmatprep.subr.bf16.mxu1 %v4869_v0 }
 0x2c5   :  { %4575 = vmatmul.mubr.msk.bf16.vlgmr.msra.gmra.mrb[100].mxu0 %vm1989_vm10, %v2384_v19 }
 0x2c6   :  { %4585 = vmatpush3.bf16.msra.mxu0 %v3302_v24  ;;  %4586 = vmatprep.mubr.msk.bf16.mxu0 %vm4870_vm0, %v4869_v0 }
 0x2c7   :  { %4581 = vmatmul.mubr.msk.bf16.vlgmr.msra.gmra.mrb[100].mxu1 %vm1989_vm10, %v2385_v33  ;;  %4596 = vmatprep.subr.bf16.mxu0 %v4869_v0 }
 0x2c8   :  { %4591 = vmatpush3.bf16.msra.mxu1 %v3347_v1  ;;  %4592 = vmatprep.mubr.msk.bf16.mxu1 %vm4870_vm0, %v4869_v0 }
 0x2c9   :  { %4602 = vmatprep.subr.bf16.mxu1 %v4869_v0 }
 0x2cd   :  { %4587 = vmatmul.mubr.msk.bf16.vlgmr.msra.gmra.mrb[104].mxu0 %vm1989_vm10, %v2386_v41  ;;  %v2265_v32 = vpop.xlane.xlu1 %2264 }
 0x2ce   :  { %4738 = vrcp.f32 %v2265_v32  ;;  %4597 = vmatpush3.bf16.msra.mxu0 %v3392_v58  ;;  %4598 = vmatprep.mubr.msk.bf16.mxu0 %vm4870_vm0, %v4869_v0 }
 0x2cf   :  { %4593 = vmatmul.mubr.msk.bf16.vlgmr.msra.gmra.mrb[104].mxu1 %vm1989_vm10, %v2387_v43  ;;  %4608 = vmatprep.subr.bf16.mxu0 %v4869_v0 }
 0x2d0   :  { %4603 = vmatpush3.bf16.msra.mxu1 %v3437_v52  ;;  %4604 = vmatprep.mubr.msk.bf16.mxu1 %vm4870_vm0, %v4869_v0 }
 0x2d1   :  { %4614 = vmatprep.subr.bf16.mxu1 %v4869_v0 }
 0x2d5   :  { %4599 = vmatmul.mubr.msk.bf16.vlgmr.msra.gmra.mrb[108].mxu0 %vm1989_vm10, %v2388_v7 }
 0x2d6   :  { %4609 = vmatpush3.bf16.msra.mxu0 %v3482_v49  ;;  %4610 = vmatprep.mubr.msk.bf16.mxu0 %vm4870_vm0, %v4869_v0 }
 0x2d7   :  { %4605 = vmatmul.mubr.msk.bf16.vlgmr.msra.gmra.mrb[108].mxu1 %vm1989_vm10, %v2389_v35  ;;  %4620 = vmatprep.subr.bf16.mxu0 %v4869_v0 }
 0x2d8   :  { %v4739_v46 = vpop.eup %4738  ;;  %4615 = vmatpush3.bf16.msra.mxu1 %v3527_v45  ;;  %4616 = vmatprep.mubr.msk.bf16.mxu1 %vm4870_vm0, %v4869_v0 }
 0x2d9   :  { %v2358_v29 = vmul.f32 %v4739_v46, %v5508_v60  ;;  %v2295_v55 = vrot.slane %v4739_v46, 1  ;;  %4626 = vmatprep.subr.bf16.mxu1 %v4869_v0  ;;  %v2296_v17 = vrot.slane %v4739_v46, 2  ;;  %v2297_v16 = vrot.slane %v4739_v46, 3 }
 0x2da   :  { %v2298_v63 = vrot.slane %v4739_v46, 4  ;;  %v2299_v59 = vrot.slane %v4739_v46, 5  ;;  %v2300_v56 = vrot.slane %v4739_v46, 6  ;;  %v2301_v34 = vrot.slane %v4739_v46, 7 }
 0x2db   :  { %v2390_v47 = vpack.c.bf16 %v2358_v29, %v2358_v29  ;;  %v2359_v18 = vmul.f32 %v5510_v28, %v2295_v55  ;;  %v2360_v60 = vmul.f32 %v5512_v8, %v2296_v17  ;;  %v2361_v28 = vmul.f32 %v5515_v25, %v2297_v16 }
 0x2dc   :  { %v3707_v8 = vsel %vm2401_vm2, %v4767_v6, 0  ;;  %v2362_v25 = vmul.f32 %v5518_v11, %v2298_v63  ;;  %v2363_v40 = vmul.f32 %v5523_v44, %v2299_v59  ;;  %v3797_v11 = vsel %vm2401_vm2, %v4769_v21, 0 }
 0x2dd   :  { %4611 = vmatmul.mubr.msk.bf16.vlgmr.msra.gmra.mrb[112].mxu0 %vm1989_vm10, %v2390_v47  ;;  %v2391_v27 = vpack.c.bf16 %v2359_v18, %v2359_v18  ;;  %v2392_v62 = vpack.c.bf16 %v2360_v60, %v2360_v60  ;;  %v2393_v38 = vpack.c.bf16 %v2361_v28, %v2361_v28  ;;  %v2364_v44 = vmul.f32 %v5527_v22, %v2300_v56 }
 0x2de   :  { %4621 = vmatpush3.bf16.msra.mxu0 %v3572_v53  ;;  %4622 = vmatprep.mubr.msk.bf16.mxu0 %vm4870_vm0, %v4869_v0  ;;  %v2394_v57 = vpack.c.bf16 %v2362_v25, %v2362_v25  ;;  %v2395_v26 = vpack.c.bf16 %v2363_v40, %v2363_v40  ;;  %v2365_v50 = vmul.f32 %v5531_v9, %v2301_v34 }
 0x2df   :  { %4617 = vmatmul.mubr.msk.bf16.vlgmr.msra.gmra.mrb[112].mxu1 %vm1989_vm10, %v2391_v27  ;;  %4632 = vmatprep.subr.bf16.mxu0 %v4869_v0  ;;  %v2396_v19 = vpack.c.bf16 %v2364_v44, %v2364_v44 }
 0x2e0   :  { %4627 = vmatpush3.bf16.msra.mxu1 %v3617_v31  ;;  %4628 = vmatprep.mubr.msk.bf16.mxu1 %vm4870_vm0, %v4869_v0  ;;  %v2397_v20 = vpack.c.bf16 %v2365_v50, %v2365_v50 }
 0x2e1   :  { %4638 = vmatprep.subr.bf16.mxu1 %v4869_v0 }
 0x2e5   :  { %4623 = vmatmul.mubr.msk.bf16.vlgmr.msra.gmra.mrb[116].mxu0 %vm1989_vm10, %v2392_v62 }
 0x2e6   :  { %4633 = vmatpush3.bf16.msra.mxu0 %v3662_v4  ;;  %4634 = vmatprep.mubr.msk.bf16.mxu0 %vm4870_vm0, %v4869_v0 }
 0x2e7   :  { %4629 = vmatmul.mubr.msk.bf16.vlgmr.msra.gmra.mrb[116].mxu1 %vm1989_vm10, %v2393_v38  ;;  %4644 = vmatprep.subr.bf16.mxu0 %v4869_v0 }
 0x2e8   :  { %4639 = vmatpush3.bf16.msra.mxu1 %v3707_v8  ;;  %4640 = vmatprep.mubr.msk.bf16.mxu1 %vm4870_vm0, %v4869_v0 }
 0x2e9   :  { %4650 = vmatprep.subr.bf16.mxu1 %v4869_v0 }
 0x2ed   :  { %4635 = vmatmul.mubr.msk.bf16.vlgmr.msra.gmra.mrb[120].mxu0 %vm1989_vm10, %v2394_v57 }
 0x2ee   :  { %4645 = vmatpush3.bf16.msra.mxu0 %v3752_v15  ;;  %4646 = vmatprep.mubr.msk.bf16.mxu0 %vm4870_vm0, %v4869_v0 }
 0x2ef   :  { %4641 = vmatmul.mubr.msk.bf16.vlgmr.msra.gmra.mrb[120].mxu1 %vm1989_vm10, %v2395_v26 }
 0x2f0   :  { %4651 = vmatpush3.bf16.msra.mxu1 %v3797_v11  ;;  %4652 = vmatprep.mubr.msk.bf16.mxu1 %vm4870_vm0, %v4869_v0 }
 0x2f5   :  { %4647 = vmatmul.mubr.msk.bf16.vlgmr.msra.gmra.mrb[124].mxu0 %vm1989_vm10, %v2396_v19 }
 0x2f7   :  { %4653 = vmatmul.mubr.msk.bf16.vlgmr.msra.gmra.mrb[124].mxu1 %vm1989_vm10, %v2397_v20 }
 0x350   :  { %v2438_v24 = vpop.f32.mrb[64].mxu0 }
 0x351   :  { %v4468_v2 = vpop.f32.mrb[65].mxu0  ;;  %v3843_v1 = vpack.c.bf16 %v2438_v24, %v2438_v24 }
 0x352   :  { %v2441_v33 = vpop.f32.mrb[66].mxu0  ;;  %v2483_v42 = vpop.f32.mrb[64].mxu1 }
 0x353   :  { %v3844_v51 = vpack.c.bf16 %v2483_v42, %v2483_v42  ;;  %v4469_v5 = vpop.f32.mrb[67].mxu0  ;;  %v4474_v22 = vpop.f32.mrb[65].mxu1  ;;  %v3917_v0 = vunpack.c.l.b16 %v3843_v1 }
 0x354   :  { %v2486_v39 = vpop.f32.mrb[66].mxu1 }
 0x355   :  { %v3918_v41 = vunpack.c.l.b16 %v3844_v51  ;;  %v4475_v48 = vpop.f32.mrb[67].mxu1 }
 0x357   :  { %v3949_v58 = vrot.slane %v3918_v41, 7 }
 0x358   :  { %v2528_v9 = vpop.f32.mrb[68].mxu0 }
 0x359   :  { %v3950_v14 = vsel %vm1923_vm3, %v3949_v58, %v3917_v0  ;;  %v3845_v32 = vpack.c.bf16 %v2528_v9, %v2528_v9  ;;  %v4480_v43 = vpop.f32.mrb[69].mxu0 }
 0x35a   :  { %v2531_v13 = vpop.f32.mrb[70].mxu0  ;;  %v2573_v52 = vpop.f32.mrb[68].mxu1 }
 0x35b   :  { %v3919_v61 = vunpack.c.l.b16 %v3845_v32  ;;  %v3846_v10 = vpack.c.bf16 %v2573_v52, %v2573_v52  ;;  %v4481_v36 = vpop.f32.mrb[71].mxu0  ;;  %v4486_v7 = vpop.f32.mrb[69].mxu1 }
 0x35c   :  { %v2576_v54 = vpop.f32.mrb[70].mxu1 }
 0x35d   :  { %v3951_v49 = vrot.slane %v3919_v61, 6  ;;  %v3920_v35 = vunpack.c.l.b16 %v3846_v10  ;;  %v4487_v23 = vpop.f32.mrb[71].mxu1 }
 0x35f   :  { %v3952_v45 = vsel %vm1926_vm4, %v3951_v49, %v3950_v14  ;;  %v3953_v46 = vrot.slane %v3920_v35, 5 }
 0x360   :  { %v2618_v29 = vpop.f32.mrb[72].mxu0 }
 0x361   :  { %v3954_v55 = vsel %vm1929_vm5, %v3953_v46, %v3952_v45  ;;  %v3847_v47 = vpack.c.bf16 %v2618_v29, %v2618_v29  ;;  %v4492_v18 = vpop.f32.mrb[73].mxu0 }
 0x362   :  { %v2621_v30 = vpop.f32.mrb[74].mxu0  ;;  %v2663_v53 = vpop.f32.mrb[72].mxu1 }
 0x363   :  { %v3921_v17 = vunpack.c.l.b16 %v3847_v47  ;;  %v3848_v27 = vpack.c.bf16 %v2663_v53, %v2663_v53  ;;  %v4493_v12 = vpop.f32.mrb[75].mxu0  ;;  %v4498_v31 = vpop.f32.mrb[73].mxu1 }
 0x364   :  { %v2666_v16 = vpop.f32.mrb[74].mxu1 }
 0x365   :  { %v3955_v60 = vrot.slane %v3921_v17, 4  ;;  %v3922_v28 = vunpack.c.l.b16 %v3848_v27  ;;  %v4499_v62 = vpop.f32.mrb[75].mxu1 }
 0x367   :  { %v3956_v3 = vsel %vm1932_vm6, %v3955_v60, %v3954_v55  ;;  %v3957_v4 = vrot.slane %v3922_v28, 3 }
 0x368   :  { %v2708_v63 = vpop.f32.mrb[76].mxu0 }
 0x369   :  { %v3958_v38 = vsel %vm1935_vm7, %v3957_v4, %v3956_v3  ;;  %v3849_v6 = vpack.c.bf16 %v2708_v63, %v2708_v63  ;;  %v4504_v8 = vpop.f32.mrb[77].mxu0 }
 0x36a   :  { %v2711_v59 = vpop.f32.mrb[78].mxu0  ;;  %v2753_v25 = vpop.f32.mrb[76].mxu1 }
 0x36b   :  { %v3923_v40 = vunpack.c.l.b16 %v3849_v6  ;;  %v3850_v57 = vpack.c.bf16 %v2753_v25, %v2753_v25  ;;  %v4505_v37 = vpop.f32.mrb[79].mxu0  ;;  %v4510_v15 = vpop.f32.mrb[77].mxu1 }
 0x36c   :  { %v2756_v56 = vpop.f32.mrb[78].mxu1 }
 0x36d   :  { %v3959_v26 = vrot.slane %v3923_v40, 2  ;;  %v3924_v21 = vunpack.c.l.b16 %v3850_v57  ;;  %v4511_v11 = vpop.f32.mrb[79].mxu1 }
 0x36f   :  { %v3960_v34 = vsel %vm1938_vm8, %v3959_v26, %v3958_v38  ;;  %v3961_v44 = vrot.slane %v3924_v21, 1 }
 0x370   :  { %v2798_v50 = vpop.f32.mrb[80].mxu0 }
 0x371   :  { %v4516_v19 = vpop.f32.mrb[81].mxu0  ;;  %v5729_v20 = vsel %vm1941_vm9, %v3961_v44, %v3960_v34  ;;  %v3851_v33 = vpack.c.bf16 %v2798_v50, %v2798_v50 }
 0x372   :  { %v2801_v24 = vpop.f32.mrb[82].mxu0  ;;  %v2843_v2 = vpop.f32.mrb[80].mxu1 }
 0x373   :  { %v3852_v42 = vpack.c.bf16 %v2843_v2, %v2843_v2  ;;  %v4517_v1 = vpop.f32.mrb[83].mxu0  ;;  %v4522_v51 = vpop.f32.mrb[81].mxu1  ;;  %v3925_v41 = vunpack.c.l.b16 %v3851_v33 }
 0x374   :  { %v2846_v5 = vpop.f32.mrb[82].mxu1 }
 0x375   :  { %v3926_v22 = vunpack.c.l.b16 %v3852_v42  ;;  %v4523_v39 = vpop.f32.mrb[83].mxu1 }
 0x377   :  { %v3963_v48 = vrot.slane %v3926_v22, 7 }
 0x378   :  { %v2888_v0 = vpop.f32.mrb[84].mxu0 }
 0x379   :  { %v3964_v58 = vsel %vm1923_vm3, %v3963_v48, %v3925_v41  ;;  %v3853_v9 = vpack.c.bf16 %v2888_v0, %v2888_v0  ;;  %v4528_v14 = vpop.f32.mrb[85].mxu0 }
 0x37a   :  { %v2891_v32 = vpop.f32.mrb[86].mxu0  ;;  %v2933_v43 = vpop.f32.mrb[84].mxu1 }
 0x37b   :  { %v3927_v13 = vunpack.c.l.b16 %v3853_v9  ;;  %v3854_v52 = vpack.c.bf16 %v2933_v43, %v2933_v43  ;;  %v4529_v61 = vpop.f32.mrb[87].mxu0  ;;  %v4534_v10 = vpop.f32.mrb[85].mxu1 }
 0x37c   :  { %v2936_v36 = vpop.f32.mrb[86].mxu1 }
 0x37d   :  { %v3965_v7 = vrot.slane %v3927_v13, 6  ;;  %v3928_v54 = vunpack.c.l.b16 %v3854_v52  ;;  %v4535_v49 = vpop.f32.mrb[87].mxu1 }
 0x37f   :  { %v3966_v35 = vsel %vm1926_vm4, %v3965_v7, %v3964_v58  ;;  %v3967_v23 = vrot.slane %v3928_v54, 5 }
 0x380   :  { %v2978_v45 = vpop.f32.mrb[88].mxu0 }
 0x381   :  { %v3968_v46 = vsel %vm1929_vm5, %v3967_v23, %v3966_v35  ;;  %v3855_v29 = vpack.c.bf16 %v2978_v45, %v2978_v45  ;;  %v4540_v55 = vpop.f32.mrb[89].mxu0 }
 0x382   :  { %v2981_v47 = vpop.f32.mrb[90].mxu0  ;;  %v3023_v18 = vpop.f32.mrb[88].mxu1 }
 0x383   :  { %v3929_v30 = vunpack.c.l.b16 %v3855_v29  ;;  %v3856_v53 = vpack.c.bf16 %v3023_v18, %v3023_v18  ;;  %v4541_v17 = vpop.f32.mrb[91].mxu0  ;;  %v4546_v27 = vpop.f32.mrb[89].mxu1 }
 0x384   :  { %v3026_v12 = vpop.f32.mrb[90].mxu1 }
 0x385   :  { %v3969_v31 = vrot.slane %v3929_v30, 4  ;;  %v3930_v16 = vunpack.c.l.b16 %v3856_v53  ;;  %v4547_v60 = vpop.f32.mrb[91].mxu1 }
 0x387   :  { %v3970_v28 = vsel %vm1932_vm6, %v3969_v31, %v3968_v46  ;;  %v3971_v62 = vrot.slane %v3930_v16, 3 }
 0x388   :  { %v3068_v3 = vpop.f32.mrb[92].mxu0 }
 0x389   :  { %v3972_v4 = vsel %vm1935_vm7, %v3971_v62, %v3970_v28  ;;  %v3857_v63 = vpack.c.bf16 %v3068_v3, %v3068_v3  ;;  %v4552_v38 = vpop.f32.mrb[93].mxu0 }
 0x38a   :  { %v3071_v6 = vpop.f32.mrb[94].mxu0  ;;  %v3113_v8 = vpop.f32.mrb[92].mxu1 }
 0x38b   :  { %v3931_v59 = vunpack.c.l.b16 %v3857_v63  ;;  %v3858_v25 = vpack.c.bf16 %v3113_v8, %v3113_v8  ;;  %v4553_v40 = vpop.f32.mrb[95].mxu0  ;;  %v4558_v57 = vpop.f32.mrb[93].mxu1 }
 0x38c   :  { %v3116_v37 = vpop.f32.mrb[94].mxu1 }
 0x38d   :  { %v3973_v15 = vrot.slane %v3931_v59, 2  ;;  %v3932_v56 = vunpack.c.l.b16 %v3858_v25  ;;  %v4559_v26 = vpop.f32.mrb[95].mxu1 }
 0x38f   :  { %v3974_v21 = vsel %vm1938_vm8, %v3973_v15, %v3972_v4  ;;  %v3975_v11 = vrot.slane %v3932_v56, 1 }
 0x390   :  { %v3158_v34 = vpop.f32.mrb[96].mxu0 }
 0x391   :  { %v4564_v44 = vpop.f32.mrb[97].mxu0  ;;  %v3976_v50 = vsel %vm1941_vm9, %v3975_v11, %v3974_v21  ;;  %v3859_v33 = vpack.c.bf16 %v3158_v34, %v3158_v34 }
 0x392   :  { %v3161_v19 = vpop.f32.mrb[98].mxu0  ;;  %v3203_v24 = vpop.f32.mrb[96].mxu1  ;;  %v4005_v2 = vpack.c.b16 %v3976_v50, %v5729_v20 }
 0x393   :  { %v3860_v42 = vpack.c.bf16 %v3203_v24, %v3203_v24  ;;  %v4565_v1 = vpop.f32.mrb[99].mxu0  ;;  %v4570_v51 = vpop.f32.mrb[97].mxu1  ;;  %v3933_v41 = vunpack.c.l.b16 %v3859_v33 }
 0x394   :  { %4007 = vrot.lane.b32.xlu0 %v4005_v2, %s4872_s2  ;;  %v3206_v5 = vpop.f32.mrb[98].mxu1 }
 0x395   :  { %v3934_v22 = vunpack.c.l.b16 %v3860_v42  ;;  %v4571_v39 = vpop.f32.mrb[99].mxu1 }
 0x397   :  { %v3977_v48 = vrot.slane %v3934_v22, 7 }
 0x398   :  { %v3248_v0 = vpop.f32.mrb[100].mxu0 }
 0x399   :  { %v3978_v58 = vsel %vm1923_vm3, %v3977_v48, %v3933_v41  ;;  %v3861_v9 = vpack.c.bf16 %v3248_v0, %v3248_v0  ;;  %v4576_v14 = vpop.f32.mrb[101].mxu0 }
 0x39a   :  { %v3251_v32 = vpop.f32.mrb[102].mxu0  ;;  %v3293_v43 = vpop.f32.mrb[100].mxu1 }
 0x39b   :  { %v3935_v20 = vunpack.c.l.b16 %v3861_v9  ;;  %v3862_v13 = vpack.c.bf16 %v3293_v43, %v3293_v43  ;;  %v4577_v52 = vpop.f32.mrb[103].mxu0  ;;  %v4582_v61 = vpop.f32.mrb[101].mxu1 }
 0x39c   :  { %v3296_v10 = vpop.f32.mrb[102].mxu1 }
 0x39d   :  { %v3979_v36 = vrot.slane %v3935_v20, 6  ;;  %v3936_v7 = vunpack.c.l.b16 %v3862_v13  ;;  %v4583_v54 = vpop.f32.mrb[103].mxu1 }
 0x39f   :  { %v3980_v49 = vsel %vm1926_vm4, %v3979_v36, %v3978_v58  ;;  %v3981_v35 = vrot.slane %v3936_v7, 5 }
 0x3a0   :  { %v3338_v23 = vpop.f32.mrb[104].mxu0 }
 0x3a1   :  { %v3982_v45 = vsel %vm1929_vm5, %v3981_v35, %v3980_v49  ;;  %v3863_v46 = vpack.c.bf16 %v3338_v23, %v3338_v23  ;;  %v4588_v29 = vpop.f32.mrb[105].mxu0 }
 0x3a2   :  { %v3341_v55 = vpop.f32.mrb[106].mxu0  ;;  %v3383_v47 = vpop.f32.mrb[104].mxu1 }
 0x3a3   :  { %v3937_v18 = vunpack.c.l.b16 %v3863_v46  ;;  %v3864_v30 = vpack.c.bf16 %v3383_v47, %v3383_v47  ;;  %v4589_v53 = vpop.f32.mrb[107].mxu0  ;;  %v4594_v17 = vpop.f32.mrb[105].mxu1 }
 0x3a4   :  { %v3386_v27 = vpop.f32.mrb[106].mxu1 }
 0x3a5   :  { %v3983_v12 = vrot.slane %v3937_v18, 4  ;;  %v3938_v31 = vunpack.c.l.b16 %v3864_v30  ;;  %v4595_v16 = vpop.f32.mrb[107].mxu1 }
 0x3a7   :  { %v3984_v60 = vsel %vm1932_vm6, %v3983_v12, %v3982_v45  ;;  %v3985_v28 = vrot.slane %v3938_v31, 3 }
 0x3a8   :  { %v3428_v62 = vpop.f32.mrb[108].mxu0 }
 0x3a9   :  { %v3986_v3 = vsel %vm1935_vm7, %v3985_v28, %v3984_v60  ;;  %v3865_v4 = vpack.c.bf16 %v3428_v62, %v3428_v62  ;;  %v4600_v63 = vpop.f32.mrb[109].mxu0 }
 0x3aa   :  { %v3431_v38 = vpop.f32.mrb[110].mxu0  ;;  %v3473_v6 = vpop.f32.mrb[108].mxu1 }
 0x3ab   :  { %v3939_v8 = vunpack.c.l.b16 %v3865_v4  ;;  %v3866_v59 = vpack.c.bf16 %v3473_v6, %v3473_v6  ;;  %v4601_v25 = vpop.f32.mrb[111].mxu0  ;;  %v4606_v40 = vpop.f32.mrb[109].mxu1 }
 0x3ac   :  { %v3476_v57 = vpop.f32.mrb[110].mxu1 }
 0x3ad   :  { %v3987_v37 = vrot.slane %v3939_v8, 2  ;;  %v3940_v15 = vunpack.c.l.b16 %v3866_v59  ;;  %v4607_v56 = vpop.f32.mrb[111].mxu1 }
 0x3af   :  { %v3988_v26 = vsel %vm1938_vm8, %v3987_v37, %v3986_v3  ;;  %v3989_v21 = vrot.slane %v3940_v15, 1 }
 0x3b0   :  { %v3518_v11 = vpop.f32.mrb[112].mxu0 }
 0x3b1   :  { %v4612_v34 = vpop.f32.mrb[113].mxu0  ;;  %v3990_v44 = vsel %vm1941_vm9, %v3989_v21, %v3988_v26  ;;  %v3867_v24 = vpack.c.bf16 %v3518_v11, %v3518_v11  ;;  %v4666_v11 = vld [vmem:[#allocation7] sm:$0xff]  }
 0x3b2   :  { %v3521_v50 = vpop.f32.mrb[114].mxu0  ;;  %v3563_v19 = vpop.f32.mrb[112].mxu1 }
 0x3b3   :  { %v3868_v2 = vpack.c.bf16 %v3563_v19, %v3563_v19  ;;  %v4613_v33 = vpop.f32.mrb[115].mxu0  ;;  %v4618_v42 = vpop.f32.mrb[113].mxu1  ;;  %v3941_v22 = vunpack.c.l.b16 %v3867_v24 }
 0x3b4   :  { %v3566_v1 = vpop.f32.mrb[114].mxu1 }
 0x3b5   :  { %v3942_v51 = vunpack.c.l.b16 %v3868_v2  ;;  %v4619_v5 = vpop.f32.mrb[115].mxu1  ;;  %v4667_v2 = vld [vmem:[#allocation7 + $0x8] sm:$0xff]  }
 0x3b7   :  { %v3991_v39 = vrot.slane %v3942_v51, 7 }
 0x3b8   :  { %v3608_v41 = vpop.f32.mrb[116].mxu0 }
 0x3b9   :  { %v3992_v48 = vsel %vm1923_vm3, %v3991_v39, %v3941_v22  ;;  %v3869_v0 = vpack.c.bf16 %v3608_v41, %v3608_v41  ;;  %v4624_v58 = vpop.f32.mrb[117].mxu0 }
 0x3ba   :  { %v3611_v9 = vpop.f32.mrb[118].mxu0  ;;  %v3653_v14 = vpop.f32.mrb[116].mxu1 }
 0x3bb   :  { %v3943_v32 = vunpack.c.l.b16 %v3869_v0  ;;  %v3870_v43 = vpack.c.bf16 %v3653_v14, %v3653_v14  ;;  %v4625_v20 = vpop.f32.mrb[119].mxu0  ;;  %v4630_v13 = vpop.f32.mrb[117].mxu1 }
 0x3bc   :  { %v3656_v52 = vpop.f32.mrb[118].mxu1 }
 0x3bd   :  { %v3993_v61 = vrot.slane %v3943_v32, 6  ;;  %v3944_v10 = vunpack.c.l.b16 %v3870_v43  ;;  %v4631_v36 = vpop.f32.mrb[119].mxu1 }
 0x3bf   :  { %v3994_v7 = vsel %vm1926_vm4, %v3993_v61, %v3992_v48  ;;  %v3995_v54 = vrot.slane %v3944_v10, 5 }
 0x3c0   :  { %v3698_v49 = vpop.f32.mrb[120].mxu0 }
 0x3c1   :  { %v3996_v35 = vsel %vm1929_vm5, %v3995_v54, %v3994_v7  ;;  %v3871_v23 = vpack.c.bf16 %v3698_v49, %v3698_v49  ;;  %v4636_v45 = vpop.f32.mrb[121].mxu0 }
 0x3c2   :  { %v3701_v46 = vpop.f32.mrb[122].mxu0  ;;  %v3743_v29 = vpop.f32.mrb[120].mxu1 }
 0x3c3   :  { %v3945_v55 = vunpack.c.l.b16 %v3871_v23  ;;  %v3872_v47 = vpack.c.bf16 %v3743_v29, %v3743_v29  ;;  %v4637_v18 = vpop.f32.mrb[123].mxu0  ;;  %v4642_v30 = vpop.f32.mrb[121].mxu1 }
 0x3c4   :  { %v3746_v53 = vpop.f32.mrb[122].mxu1 }
 0x3c5   :  { %v3997_v17 = vrot.slane %v3945_v55, 4  ;;  %v3946_v27 = vunpack.c.l.b16 %v3872_v47  ;;  %v4643_v12 = vpop.f32.mrb[123].mxu1 }
 0x3c7   :  { %v3998_v31 = vsel %vm1932_vm6, %v3997_v17, %v3996_v35  ;;  %v3999_v16 = vrot.slane %v3946_v27, 3 }
 0x3c8   :  { %v3788_v60 = vpop.f32.mrb[124].mxu0 }
 0x3c9   :  { %v4000_v28 = vsel %vm1935_vm7, %v3999_v16, %v3998_v31  ;;  %v3873_v62 = vpack.c.bf16 %v3788_v60, %v3788_v60  ;;  %v4648_v3 = vpop.f32.mrb[125].mxu0 }
 0x3ca   :  { %v3791_v4 = vpop.f32.mrb[126].mxu0  ;;  %v3833_v63 = vpop.f32.mrb[124].mxu1 }
 0x3cb   :  { %v3947_v38 = vunpack.c.l.b16 %v3873_v62  ;;  %v3874_v6 = vpack.c.bf16 %v3833_v63, %v3833_v63  ;;  %v4649_v8 = vpop.f32.mrb[127].mxu0  ;;  %v4654_v59 = vpop.f32.mrb[125].mxu1 }
 0x3cc   :  { %v3836_v25 = vpop.f32.mrb[126].mxu1 }
 0x3cd   :  { %v4001_v40 = vrot.slane %v3947_v38, 2  ;;  %v3948_v57 = vunpack.c.l.b16 %v3874_v6  ;;  %v4655_v37 = vpop.f32.mrb[127].mxu1 }
 0x3cf   :  { %v4002_v15 = vsel %vm1938_vm8, %v4001_v40, %v4000_v28  ;;  %v4003_v56 = vrot.slane %v3948_v57, 1 }
 0x3d1   :  { %v4004_v26 = vsel %vm1941_vm9, %v4003_v56, %v4002_v15 }
 0x3d2   :  { %v4006_v21 = vpack.c.b16 %v4004_v26, %v3990_v44 }
 0x3d4   :  { %4009 = vrot.lane.b32.xlu1 %v4006_v21, %s4872_s2 }
 0x406   :  { %v4008_v34 = vpop.permute.xlu0 %4007 }
 0x407   :  { %v4013_v50 = vsel %vm230_vm1, %v4666_v11, %v4008_v34 }
 0x408   :  { %v4140_v19 = vcombine.low %v4013_v50, %v4013_v50  ;;  %v4141_v24 = vcombine.high %v4013_v50, %v4013_v50 }
 0x40a   :  { %4032 = vst.msk [vmem:[#allocation8] sm:$0xf] %vm4031_vm11, %v4140_v19  ;;  %4033 = vst.msk [vmem:[#allocation8 + $0x4] sm:$0xf] %vm4031_vm11, %v4141_v24 }
 0x446   :  { %v4010_v33 = vpop.permute.xlu1 %4009 }
 0x447   :  { %v4016_v42 = vsel %vm230_vm1, %v4667_v2, %v4010_v33 }
 0x448   :  { %v4142_v1 = vcombine.low %v4016_v42, %v4016_v42  ;;  %v4143_v51 = vcombine.high %v4016_v42, %v4016_v42 }
 0x44a   :  { %4034 = vst.msk [vmem:[#allocation8 + $0x8] sm:$0xf] %vm4031_vm11, %v4142_v1  ;;  %4035 = vst.msk [vmem:[#allocation8 + $0xc] sm:$0xf] %vm4031_vm11, %v4143_v51 }
 0x44b   :  { %4847 = shalt.err (!%p4844_p0)
}
 0x44c   :  { %s4848_s28 = scalar_lea.hbm %s5775_s3, 256 }
 0x44d   :  { %p4849_p1 = scmp.ne.s32.totalorder %s5775_s3, %s4848_s28  ;;  %p4852_p2 = scmp.lt.u32.totalorder %s4848_s28, %s5775_s3 }
 0x44f   :  { %p4854_p3 = pnand %p4852_p2, %p4849_p1 }
 0x451   :  { %4857 = shalt.err (!%p4854_p3)
}
 0x452   :  { %4047 = dma.vmem_to_hbm [thread:$0]  %s4042_s22, 256, %s5775_s3, [#allocation4], %s4866_s24, %s4866_s24, %s4867_s25  }
 0x453   :  { %4862 = dma.done.wait [#allocation4], 256  }
 0x454   :  { %4863 = vsyncadd [#allocation4], 4294967040 }
 0x455   :  { %4051 = vsyncpa [#allocation3], 1 }
 0x456   :  { %4052 = vsyncpa [#allocation6], 1 }
 0x457   :  { %4053 = vsyncpa [#allocation4], 1 }

</bundles_post_ra>
